<compile_context>
chip_gen: v5e
topology: v5e:2x2
jax: 0.10.0
libtpu: 0.0.40
codegen_flags: <defaults>
</compile_context>

<pallas_src>
import math
import functools

import jax
import jax.numpy as jnp
from jax.experimental import pallas as pl
from jax.experimental.pallas import tpu as pltpu


def _akt_attention_kernel(gamma_ref, q_ref, k_ref, v_ref, o_ref, acc_ref, *,
                          n_heads, d_k, seq_len, block_q, zero_pad, mask_offset):
    """One (batch, q-block) step of AKT monotonic attention, all heads."""
    qi = pl.program_id(1)
    inv_sqrt_dk = jnp.float32(1.0 / math.sqrt(d_k))

    # Global query-row / key-column indices for this query block.
    row_ids = (jax.lax.broadcasted_iota(jnp.int32, (block_q, seq_len), 0)
               + qi * block_q)
    col_ids = jax.lax.broadcasted_iota(jnp.int32, (block_q, seq_len), 1)

    keep = col_ids <= (row_ids - mask_offset)       # causal AKT mask, True = attend
    keep_f = keep.astype(jnp.float32)
    position_effect = jnp.abs(col_ids - row_ids).astype(jnp.float32)
    neg_big = jnp.float32(-1e32)

    if zero_pad:
        keep_row = (row_ids != 0).astype(jnp.float32)   # zero out global query row 0

    # TODO(synk): per review, QK^T / P@V could be fused across heads with a
    # head-batched dot_general; kept as a static per-head loop here so only one
    # head's (block_q, S) temporaries are live at a time (VMEM headroom on v7x).
    for hh in range(n_heads):            # static loop; n_heads is small for AKT
        lo = hh * d_k
        hi = lo + d_k
        q_h = q_ref[:, lo:hi]            # (BLOCK_Q, d_k) bf16
        k_h = k_ref[:, lo:hi]            # (S, d_k)       bf16
        v_h = v_ref[:, lo:hi]            # (S, d_k)       bf16

        # scores = (q @ k^T) / sqrt(d_k): bf16 MXU operands, f32 accumulation.
        scores = jax.lax.dot_general(
            q_h, k_h, (((1,), (1,)), ((), ())),
            preferred_element_type=jnp.float32) * inv_sqrt_dk     # (BLOCK_Q, S)

        # --- first (masked) softmax, only used for the distance statistics ---
        # Exact reciprocal here: p1 feeds (disttotal - distcum) -> sqrt, a
        # difference of near-equal quantities for the right-most key columns.
        s1 = jnp.where(keep, scores, neg_big)
        s1 = s1 - jnp.max(s1, axis=-1, keepdims=True)
        e1 = jnp.exp(s1)
        p1 = e1 / jnp.sum(e1, axis=-1, keepdims=True)
        p1 = p1 * keep_f                 # required: zeroes fully-masked rows

        # distcum = inclusive cumsum of p1 along keys: Hillis-Steele doubling
        # scan of log2(S) XLU rotations + masked adds (replaces the old
        # (S, S) f32 cumsum-via-matmul).  pltpu.roll matches jnp.roll
        # semantics (element j comes from j - shift); wrapped lanes are masked.
        distcum = p1
        shift = 1
        while shift < seq_len:
            rolled = pltpu.roll(distcum, shift=shift, axis=1)
            distcum = distcum + jnp.where(col_ids >= shift, rolled, 0.0)
            shift *= 2

        disttotal = jnp.sum(p1, axis=-1, keepdims=True)
        dist_scores = jnp.sqrt(
            jnp.maximum((disttotal - distcum) * position_effect, 0.0))

        gamma = gamma_ref[hh]                        # scalar: -softplus(gammas[hh])
        total_effect = jnp.clip(jnp.exp(dist_scores * gamma), 1e-5, 1e5)

        # NOTE: the reference calls `scores.masked_fill(mask == 0, -1e23)` WITHOUT
        # assignment -> a no-op in PyTorch; faithfully NOT re-masked here.
        s2 = scores * total_effect
        s2 = s2 - jnp.max(s2, axis=-1, keepdims=True)
        e2 = jnp.exp(s2)
        p2 = e2 * pl.reciprocal(jnp.sum(e2, axis=-1, keepdims=True), approx=True)
        if zero_pad:
            p2 = p2 * keep_row
        # TODO(synk): nn.Dropout is identity in eval mode; no dropout applied.
        # TODO(synk): on v6e/v7x the exp passes could run in bf16 (~2x EUP); kept
        #             f32 so one code path stays correct on v5e (no bf16 VPU/EUP).

        # Head result -> f32 VMEM scratch slice (bounds this head's live range).
        acc_ref[:, lo:hi] = jnp.dot(p2.astype(v_h.dtype), v_h,
                                    preferred_element_type=jnp.float32)

    # Single lane-dense store of all heads: (BLOCK_Q, d_model), bf16 writeback.
    o_ref[...] = acc_ref[...].astype(o_ref.dtype)


def _vmem_capacity_bytes():
    try:
        return int(pltpu.get_tpu_info().vmem_capacity_bytes)
    except Exception:
        return 128 * 1024 * 1024        # v5e/v6e-style default if query fails


def _kv_block_spec(s, d_model):
    idx = lambda b, qi: (b, 0, 0)
    try:
        # K/V block index only changes with the batch index -> the second
        # pipeline buffer buys no overlap; single-buffer to halve resident VMEM.
        return pl.BlockSpec((None, s, d_model), idx, pipeline_mode=pl.Buffered(1))
    except Exception:
        return pl.BlockSpec((None, s, d_model), idx)


def attention_core(q, k, v, gamma_neg, *, n_heads, zero_pad,
                   mask_offset=0, block_q=None):
    """q, k, v: (bs, S, d_model) projected activations (head h in columns
    [h*d_k, (h+1)*d_k)); gamma_neg: (n_heads,) f32 = -softplus(gammas).
    Returns (bs, S, d_model) bf16 per-head attention outputs, head-concatenated."""
    bs, s, d_model = q.shape
    assert d_model % n_heads == 0
    d_k = d_model // n_heads

    vmem_cap = _vmem_capacity_bytes()
    if block_q is None:
        if s <= 512:
            block_q = s
        elif vmem_cap <= 80 * 1024 * 1024:   # v7x-class parts: 64 MiB VMEM/TC
            block_q = 128
        else:                                # v5e / v6e: 128 MiB VMEM
            block_q = 256
    assert s % block_q == 0, "seq length must be a multiple of block_q"

    compute_dtype = jnp.bfloat16             # bf16 operands, f32 MXU accumulation
    if q.dtype != compute_dtype:
        q = q.astype(compute_dtype)
    if k.dtype != compute_dtype:
        k = k.astype(compute_dtype)
    if v.dtype != compute_dtype:
        v = v.astype(compute_dtype)

    kernel = functools.partial(
        _akt_attention_kernel, n_heads=n_heads, d_k=d_k, seq_len=s,
        block_q=block_q, zero_pad=zero_pad, mask_offset=mask_offset)

    q_spec = pl.BlockSpec((None, block_q, d_model), lambda b, qi: (b, qi, 0))
    kv_spec = _kv_block_spec(s, d_model)
    out_spec = pl.BlockSpec((None, block_q, d_model), lambda b, qi: (b, qi, 0))

    vmem_limit = int(min(100 * 1024 * 1024, vmem_cap * 0.85))

    # Grid order (batch, q-block): batch leads so a 2-TC core split (v7x)
    # prefers the batch axis and each core fetches disjoint K/V.
    return pl.pallas_call(
        kernel,
        out_shape=jax.ShapeDtypeStruct((bs, s, d_model), jnp.bfloat16),
        grid_spec=pltpu.PrefetchScalarGridSpec(
            num_scalar_prefetch=0,
            grid=(bs, s // block_q),
            in_specs=[
                pl.BlockSpec(memory_space=pltpu.MemorySpace.SMEM),   # gamma_neg (h,)
                q_spec,                                              # q
                kv_spec,                                             # k (full seq)
                kv_spec,                                             # v (full seq)
            ],
            out_specs=out_spec,
            scratch_shapes=[pltpu.VMEM((block_q, d_model), jnp.float32)],
        ),
        compiler_params=pltpu.CompilerParams(
            dimension_semantics=("parallel", "parallel"),
            vmem_limit_bytes=vmem_limit),
    )(gamma_neg, q, k, v)


def init_mha_params(key, d_model, n_heads, kq_same, bias=True):
    """Deterministic synthetic init matching the PyTorch parameter shapes."""
    keys = jax.random.split(key, 8)

    def linear_params(kw, kb):
        limit = math.sqrt(6.0 / (d_model + d_model))
        W = jax.random.uniform(kw, (d_model, d_model), jnp.float32, -limit, limit)
        if bias:
            b = jax.random.uniform(kb, (d_model,), jnp.float32, -0.01, 0.01)
        else:
            b = jnp.zeros((d_model,), jnp.float32)
        return W, b

    params = {}
    params["k_W"], params["k_b"] = linear_params(keys[0], keys[1])
    params["v_W"], params["v_b"] = linear_params(keys[2], keys[3])
    if not kq_same:
        params["q_W"], params["q_b"] = linear_params(keys[4], keys[5])
    params["out_W"], params["out_b"] = linear_params(keys[6], keys[7])
    glimit = math.sqrt(6.0 / 2.0)         # xavier_uniform_ on (n_heads, 1, 1)
    params["gammas"] = jax.random.uniform(
        jax.random.fold_in(key, 99), (n_heads, 1, 1), jnp.float32, -glimit, glimit)
    return params


def multi_head_attention(params, q, k, v, *, n_heads, kq_same, zero_pad,
                         mask_offset=0, block_q=None):
    """AKT MultiHeadAttention.forward.  AKT's mask is always the causal tril
    (diagonal included for mask_offset=0, excluded for mask_offset=1); it is
    synthesized inside the kernel instead of being DMA'd as an (S, S) tensor.
    # TODO(synk): arbitrary non-causal dense masks would need a (block_q, S)
    #             mask input spec; not exercised by the AKT module."""
    def lin_bf16(x, W, b):   # nn.Linear y = x @ W^T + b, bf16 cast fused in epilogue
        return (jnp.dot(x, W.T, preferred_element_type=jnp.float32)
                + b).astype(jnp.bfloat16)

    k_p = lin_bf16(k, params["k_W"], params["k_b"])
    if kq_same:
        q_p = lin_bf16(q, params["k_W"], params["k_b"])
    else:
        q_p = lin_bf16(q, params["q_W"], params["q_b"])
    v_p = lin_bf16(v, params["v_W"], params["v_b"])

    gamma_neg = (-jax.nn.softplus(params["gammas"])).reshape(n_heads).astype(jnp.float32)

    # (bs, S, d_model) in -> (bs, S, d_model) bf16 out: no split-head/concat transposes.
    attn = attention_core(q_p, k_p, v_p, gamma_neg, n_heads=n_heads,
                          zero_pad=zero_pad, mask_offset=mask_offset,
                          block_q=block_q)
    return jnp.dot(attn.astype(jnp.float32), params["out_W"].T) + params["out_b"]


def reference_mha(params, q, k, v, mask, *, n_heads, kq_same, zero_pad):
    """Pure-JAX f32 port of the PyTorch reference, for the correctness check."""
    bs, s, d_model = q.shape
    d_k = d_model // n_heads

    def lin(x, W, b):
        return jnp.dot(x, W.T) + b

    def split(x):
        return x.reshape(bs, s, n_heads, d_k).transpose(0, 2, 1, 3)

    k_p = split(lin(k, params["k_W"], params["k_b"]))
    if kq_same:
        q_p = split(lin(q, params["k_W"], params["k_b"]))
    else:
        q_p = split(lin(q, params["q_W"], params["q_b"]))
    v_p = split(lin(v, params["v_W"], params["v_b"]))

    scores = jnp.einsum("bhqd,bhkd->bhqk", q_p, k_p) / math.sqrt(d_k)
    maskb = mask.astype(bool)[None, None]
    s_ = jnp.where(maskb, scores, -1e32)
    s_ = jax.nn.softmax(s_, axis=-1) * mask.astype(jnp.float32)[None, None]
    distcum = jnp.cumsum(s_, axis=-1)
    disttot = jnp.sum(s_, axis=-1, keepdims=True)
    x1 = jnp.arange(s)[None, :]
    x2 = jnp.arange(s)[:, None]
    pos = jnp.abs(x1 - x2).astype(jnp.float32)[None, None]
    dist = jnp.sqrt(jnp.maximum((disttot - distcum) * pos, 0.0))
    gamma = (-jax.nn.softplus(params["gammas"]))[None]            # (1, h, 1, 1)
    total_effect = jnp.clip(jnp.exp(dist * gamma), 1e-5, 1e5)
    scores = jax.nn.softmax(scores * total_effect, axis=-1)       # no re-mask (ref no-op)
    if zero_pad:
        scores = scores.at[:, :, 0, :].set(0.0)
    out = jnp.einsum("bhqk,bhkd->bhqd", scores, v_p)
    concat = out.transpose(0, 2, 1, 3).reshape(bs, s, d_model)
    return lin(concat, params["out_W"], params["out_b"])


if __name__ == "__main__":
    bs, seq, d_model, n_heads = 2, 8, 32, 4
    kq_same = False
    zero_pad = True

    key = jax.random.PRNGKey(0)
    kq_, kk_, kv_, kp_ = jax.random.split(key, 4)
    q = jax.random.normal(kq_, (bs, seq, d_model), jnp.float32)
    k = jax.random.normal(kk_, (bs, seq, d_model), jnp.float32)
    v = jax.random.normal(kv_, (bs, seq, d_model), jnp.float32)

    params = init_mha_params(kp_, d_model, n_heads, kq_same)

    out = multi_head_attention(params, q, k, v, n_heads=n_heads,
                               kq_same=kq_same, zero_pad=zero_pad)
    out = jax.block_until_ready(out)
    assert out.shape == (bs, seq, d_model)

    # Sanity check vs. a pure-JAX f32 reference.  The kernel runs bf16 operands
    # (f32 accumulation) and emits bf16, so the tolerance is loose by design.
    mask = jnp.tril(jnp.ones((seq, seq), jnp.int32))   # AKT causal mask (mask_offset=0)
    ref = reference_mha(params, q, k, v, mask, n_heads=n_heads,
                        kq_same=kq_same, zero_pad=zero_pad)
    max_err = float(jnp.max(jnp.abs(out - ref)))
    assert max_err < 0.1, f"kernel deviates from reference: max_err={max_err}"

    print("KERNEL_OK")
</pallas_src>

<mosaic_0001>
module attributes {stable_mosaic.version = 11 : i64} {
  func.func @_akt_attention_kernel(%arg0: i32, %arg1: i32, %arg2: memref<4xf32, #tpu.memory_space<smem>>, %arg3: memref<1x8x32xbf16, #tpu.memory_space<vmem>>, %arg4: memref<1x8x32xbf16, #tpu.memory_space<vmem>>, %arg5: memref<1x8x32xbf16, #tpu.memory_space<vmem>>, %arg6: memref<1x8x32xbf16, #tpu.memory_space<vmem>>, %arg7: memref<8x32xf32, #tpu.memory_space<vmem>>) attributes {dimension_semantics = [#tpu.dimension_semantics<parallel>, #tpu.dimension_semantics<parallel>], iteration_bounds = array<i64: 2, 1>, scalar_prefetch = 0 : i64, scratch_operands = 1 : i64, tpu.core_type = #tpu.core_type<tc>, window_params = [{transform_indices = @transform_0, window_bounds = array<i64: 4>}, {transform_indices = @transform_1, window_bounds = array<i64: 1, 8, 32>}, {pipeline_mode = #tpu.pipeline_mode<synchronous>, transform_indices = @transform_2, window_bounds = array<i64: 1, 8, 32>}, {pipeline_mode = #tpu.pipeline_mode<synchronous>, transform_indices = @transform_3, window_bounds = array<i64: 1, 8, 32>}, {transform_indices = @transform_4, window_bounds = array<i64: 1, 8, 32>}]} {
    %0 = tpu.iota {dimensions = array<i32: 0>} : vector<8x8xi32>
    %c8_i32 = arith.constant 8 : i32
    %1 = arith.muli %arg1, %c8_i32 : i32
    %2 = vector.broadcast %1 : i32 to vector<8x8xi32>
    %3 = arith.addi %0, %2 : vector<8x8xi32>
    %4 = tpu.iota {dimensions = array<i32: 1>} : vector<8x8xi32>
    %c0_i32 = arith.constant 0 : i32
    %5 = vector.broadcast %c0_i32 : i32 to vector<8x8xi32>
    %6 = arith.subi %3, %5 : vector<8x8xi32>
    %7 = arith.cmpi sle, %4, %6 : vector<8x8xi32>
    %8 = arith.extui %7 : vector<8x8xi1> to vector<8x8xi32>
    %9 = arith.sitofp %8 : vector<8x8xi32> to vector<8x8xf32>
    %10 = arith.subi %4, %3 : vector<8x8xi32>
    %11 = math.absi %10 : vector<8x8xi32>
    %12 = arith.sitofp %11 : vector<8x8xi32> to vector<8x8xf32>
    %c0_i32_0 = arith.constant 0 : i32
    %13 = vector.broadcast %c0_i32_0 : i32 to vector<8x8xi32>
    %14 = arith.cmpi ne, %3, %13 : vector<8x8xi32>
    %15 = arith.extui %14 : vector<8x8xi1> to vector<8x8xi32>
    %16 = arith.sitofp %15 : vector<8x8xi32> to vector<8x8xf32>
    %c0 = arith.constant 0 : index
    %c0_1 = arith.constant 0 : index
    %c0_2 = arith.constant 0 : index
    %17 = vector.load %arg3[%c0, %c0_1, %c0_2] : memref<1x8x32xbf16, #tpu.memory_space<vmem>>, vector<1x8x8xbf16>
    %18 = vector.shape_cast %17 : vector<1x8x8xbf16> to vector<8x8xbf16>
    %c0_3 = arith.constant 0 : index
    %c0_4 = arith.constant 0 : index
    %c0_5 = arith.constant 0 : index
    %19 = vector.load %arg4[%c0_3, %c0_4, %c0_5] : memref<1x8x32xbf16, #tpu.memory_space<vmem>>, vector<1x8x8xbf16>
    %20 = vector.shape_cast %19 : vector<1x8x8xbf16> to vector<8x8xbf16>
    %c0_6 = arith.constant 0 : index
    %c0_7 = arith.constant 0 : index
    %c0_8 = arith.constant 0 : index
    %21 = vector.load %arg5[%c0_6, %c0_7, %c0_8] : memref<1x8x32xbf16, #tpu.memory_space<vmem>>, vector<1x8x8xbf16>
    %22 = vector.shape_cast %21 : vector<1x8x8xbf16> to vector<8x8xbf16>
    %cst = arith.constant dense<0.000000e+00> : vector<8x8xf32>
    %23 = tpu.matmul %18, %20, %cst {dimension_numbers = #tpu.dot_dimension_numbers<[1], [1], [0], [0], [0, 0, 1, 0], [], []>} : vector<8x8xbf16>, vector<8x8xbf16>, vector<8x8xf32> -> vector<8x8xf32>
    %cst_9 = arith.constant 0.353553385 : f32
    %24 = vector.broadcast %cst_9 : f32 to vector<8x8xf32>
    %25 = arith.mulf %23, %24 : vector<8x8xf32>
    %cst_10 = arith.constant -1.000000e+32 : f32
    %26 = vector.broadcast %cst_10 : f32 to vector<8x8xf32>
    %27 = arith.select %7, %25, %26 : vector<8x8xi1>, vector<8x8xf32>
    %cst_11 = arith.constant dense<0xFF800000> : vector<8xf32>
    %28 = vector.multi_reduction <maximumf>, %27, %cst_11 [1] : vector<8x8xf32> to vector<8xf32>
    %29 = vector.shape_cast %28 : vector<8xf32> to vector<8x1xf32>
    %30 = vector.broadcast %29 : vector<8x1xf32> to vector<8x8xf32>
    %31 = arith.subf %27, %30 : vector<8x8xf32>
    %32 = math.exp %31 : vector<8x8xf32>
    %cst_12 = arith.constant dense<0.000000e+00> : vector<8xf32>
    %33 = vector.multi_reduction <add>, %32, %cst_12 [1] : vector<8x8xf32> to vector<8xf32>
    %34 = vector.shape_cast %33 : vector<8xf32> to vector<8x1xf32>
    %35 = vector.broadcast %34 : vector<8x1xf32> to vector<8x8xf32>
    %36 = arith.divf %32, %35 : vector<8x8xf32>
    %37 = arith.mulf %36, %9 : vector<8x8xf32>
    %c1_i32 = arith.constant 1 : i32
    %38 = tpu.dynamic_rotate %37 by %c1_i32 dim 1 : vector<8x8xf32>, i32 -> vector<8x8xf32>
    %c1_i32_13 = arith.constant 1 : i32
    %39 = vector.broadcast %c1_i32_13 : i32 to vector<8x8xi32>
    %40 = arith.cmpi sge, %4, %39 : vector<8x8xi32>
    %cst_14 = arith.constant 0.000000e+00 : f32
    %41 = vector.broadcast %cst_14 : f32 to vector<8x8xf32>
    %42 = arith.select %40, %38, %41 : vector<8x8xi1>, vector<8x8xf32>
    %43 = arith.addf %37, %42 : vector<8x8xf32>
    %c2_i32 = arith.constant 2 : i32
    %44 = tpu.dynamic_rotate %43 by %c2_i32 dim 1 : vector<8x8xf32>, i32 -> vector<8x8xf32>
    %c2_i32_15 = arith.constant 2 : i32
    %45 = vector.broadcast %c2_i32_15 : i32 to vector<8x8xi32>
    %46 = arith.cmpi sge, %4, %45 : vector<8x8xi32>
    %cst_16 = arith.constant 0.000000e+00 : f32
    %47 = vector.broadcast %cst_16 : f32 to vector<8x8xf32>
    %48 = arith.select %46, %44, %47 : vector<8x8xi1>, vector<8x8xf32>
    %49 = arith.addf %43, %48 : vector<8x8xf32>
    %c4_i32 = arith.constant 4 : i32
    %50 = tpu.dynamic_rotate %49 by %c4_i32 dim 1 : vector<8x8xf32>, i32 -> vector<8x8xf32>
    %c4_i32_17 = arith.constant 4 : i32
    %51 = vector.broadcast %c4_i32_17 : i32 to vector<8x8xi32>
    %52 = arith.cmpi sge, %4, %51 : vector<8x8xi32>
    %cst_18 = arith.constant 0.000000e+00 : f32
    %53 = vector.broadcast %cst_18 : f32 to vector<8x8xf32>
    %54 = arith.select %52, %50, %53 : vector<8x8xi1>, vector<8x8xf32>
    %55 = arith.addf %49, %54 : vector<8x8xf32>
    %cst_19 = arith.constant dense<0.000000e+00> : vector<8xf32>
    %56 = vector.multi_reduction <add>, %37, %cst_19 [1] : vector<8x8xf32> to vector<8xf32>
    %57 = vector.shape_cast %56 : vector<8xf32> to vector<8x1xf32>
    %58 = vector.broadcast %57 : vector<8x1xf32> to vector<8x8xf32>
    %59 = arith.subf %58, %55 : vector<8x8xf32>
    %60 = arith.mulf %59, %12 : vector<8x8xf32>
    %cst_20 = arith.constant 0.000000e+00 : f32
    %61 = vector.broadcast %cst_20 : f32 to vector<8x8xf32>
    %62 = arith.maximumf %60, %61 : vector<8x8xf32>
    %63 = math.sqrt %62 : vector<8x8xf32>
    %c0_21 = arith.constant 0 : index
    %64 = memref.load %arg2[%c0_21] : memref<4xf32, #tpu.memory_space<smem>>
    %65 = vector.broadcast %64 : f32 to vector<8x8xf32>
    %66 = arith.mulf %63, %65 : vector<8x8xf32>
    %67 = math.exp %66 : vector<8x8xf32>
    %cst_22 = arith.constant 9.99999974E-6 : f32
    %cst_23 = arith.constant 1.000000e+05 : f32
    %68 = vector.broadcast %cst_22 : f32 to vector<8x8xf32>
    %69 = arith.maximumf %68, %67 : vector<8x8xf32>
    %70 = vector.broadcast %cst_23 : f32 to vector<8x8xf32>
    %71 = arith.minimumf %70, %69 : vector<8x8xf32>
    %72 = arith.mulf %25, %71 : vector<8x8xf32>
    %cst_24 = arith.constant dense<0xFF800000> : vector<8xf32>
    %73 = vector.multi_reduction <maximumf>, %72, %cst_24 [1] : vector<8x8xf32> to vector<8xf32>
    %74 = vector.shape_cast %73 : vector<8xf32> to vector<8x1xf32>
    %75 = vector.broadcast %74 : vector<8x1xf32> to vector<8x8xf32>
    %76 = arith.subf %72, %75 : vector<8x8xf32>
    %77 = math.exp %76 : vector<8x8xf32>
    %cst_25 = arith.constant dense<0.000000e+00> : vector<8xf32>
    %78 = vector.multi_reduction <add>, %77, %cst_25 [1] : vector<8x8xf32> to vector<8xf32>
    %79 = vector.shape_cast %78 : vector<8xf32> to vector<8x1xf32>
    %80 = tpu.reciprocal %79 {approx = true} : vector<8x1xf32> -> vector<8x1xf32>
    %81 = vector.broadcast %80 : vector<8x1xf32> to vector<8x8xf32>
    %82 = arith.mulf %77, %81 : vector<8x8xf32>
    %83 = arith.mulf %82, %16 : vector<8x8xf32>
    %84 = arith.truncf %83 : vector<8x8xf32> to vector<8x8xbf16>
    %cst_26 = arith.constant dense<0.000000e+00> : vector<8x8xf32>
    %85 = tpu.matmul %84, %22, %cst_26 {dimension_numbers = #tpu.dot_dimension_numbers<[1], [0], [0], [1], [0, 0, 1, 1], [], []>} : vector<8x8xbf16>, vector<8x8xbf16>, vector<8x8xf32> -> vector<8x8xf32>
    %c0_27 = arith.constant 0 : index
    %c0_28 = arith.constant 0 : index
    %86 = vector.load %arg7[%c0_27, %c0_28] : memref<8x32xf32, #tpu.memory_space<vmem>>, vector<8x8xf32>
    tpu.vector_store %arg7[%c0_27, %c0_28], %85 {strides = array<i32>} : memref<8x32xf32, #tpu.memory_space<vmem>>, vector<8x8xf32>,
    %c0_29 = arith.constant 0 : index
    %c0_30 = arith.constant 0 : index
    %c8 = arith.constant 8 : index
    %87 = vector.load %arg3[%c0_29, %c0_30, %c8] : memref<1x8x32xbf16, #tpu.memory_space<vmem>>, vector<1x8x8xbf16>
    %88 = vector.shape_cast %87 : vector<1x8x8xbf16> to vector<8x8xbf16>
    %c0_31 = arith.constant 0 : index
    %c0_32 = arith.constant 0 : index
    %c8_33 = arith.constant 8 : index
    %89 = vector.load %arg4[%c0_31, %c0_32, %c8_33] : memref<1x8x32xbf16, #tpu.memory_space<vmem>>, vector<1x8x8xbf16>
    %90 = vector.shape_cast %89 : vector<1x8x8xbf16> to vector<8x8xbf16>
    %c0_34 = arith.constant 0 : index
    %c0_35 = arith.constant 0 : index
    %c8_36 = arith.constant 8 : index
    %91 = vector.load %arg5[%c0_34, %c0_35, %c8_36] : memref<1x8x32xbf16, #tpu.memory_space<vmem>>, vector<1x8x8xbf16>
    %92 = vector.shape_cast %91 : vector<1x8x8xbf16> to vector<8x8xbf16>
    %cst_37 = arith.constant dense<0.000000e+00> : vector<8x8xf32>
    %93 = tpu.matmul %88, %90, %cst_37 {dimension_numbers = #tpu.dot_dimension_numbers<[1], [1], [0], [0], [0, 0, 1, 0], [], []>} : vector<8x8xbf16>, vector<8x8xbf16>, vector<8x8xf32> -> vector<8x8xf32>
    %cst_38 = arith.constant 0.353553385 : f32
    %94 = vector.broadcast %cst_38 : f32 to vector<8x8xf32>
    %95 = arith.mulf %93, %94 : vector<8x8xf32>
    %cst_39 = arith.constant -1.000000e+32 : f32
    %96 = vector.broadcast %cst_39 : f32 to vector<8x8xf32>
    %97 = arith.select %7, %95, %96 : vector<8x8xi1>, vector<8x8xf32>
    %cst_40 = arith.constant dense<0xFF800000> : vector<8xf32>
    %98 = vector.multi_reduction <maximumf>, %97, %cst_40 [1] : vector<8x8xf32> to vector<8xf32>
    %99 = vector.shape_cast %98 : vector<8xf32> to vector<8x1xf32>
    %100 = vector.broadcast %99 : vector<8x1xf32> to vector<8x8xf32>
    %101 = arith.subf %97, %100 : vector<8x8xf32>
    %102 = math.exp %101 : vector<8x8xf32>
    %cst_41 = arith.constant dense<0.000000e+00> : vector<8xf32>
    %103 = vector.multi_reduction <add>, %102, %cst_41 [1] : vector<8x8xf32> to vector<8xf32>
    %104 = vector.shape_cast %103 : vector<8xf32> to vector<8x1xf32>
    %105 = vector.broadcast %104 : vector<8x1xf32> to vector<8x8xf32>
    %106 = arith.divf %102, %105 : vector<8x8xf32>
    %107 = arith.mulf %106, %9 : vector<8x8xf32>
    %c1_i32_42 = arith.constant 1 : i32
    %108 = tpu.dynamic_rotate %107 by %c1_i32_42 dim 1 : vector<8x8xf32>, i32 -> vector<8x8xf32>
    %c1_i32_43 = arith.constant 1 : i32
    %109 = vector.broadcast %c1_i32_43 : i32 to vector<8x8xi32>
    %110 = arith.cmpi sge, %4, %109 : vector<8x8xi32>
    %cst_44 = arith.constant 0.000000e+00 : f32
    %111 = vector.broadcast %cst_44 : f32 to vector<8x8xf32>
    %112 = arith.select %110, %108, %111 : vector<8x8xi1>, vector<8x8xf32>
    %113 = arith.addf %107, %112 : vector<8x8xf32>
    %c2_i32_45 = arith.constant 2 : i32
    %114 = tpu.dynamic_rotate %113 by %c2_i32_45 dim 1 : vector<8x8xf32>, i32 -> vector<8x8xf32>
    %c2_i32_46 = arith.constant 2 : i32
    %115 = vector.broadcast %c2_i32_46 : i32 to vector<8x8xi32>
    %116 = arith.cmpi sge, %4, %115 : vector<8x8xi32>
    %cst_47 = arith.constant 0.000000e+00 : f32
    %117 = vector.broadcast %cst_47 : f32 to vector<8x8xf32>
    %118 = arith.select %116, %114, %117 : vector<8x8xi1>, vector<8x8xf32>
    %119 = arith.addf %113, %118 : vector<8x8xf32>
    %c4_i32_48 = arith.constant 4 : i32
    %120 = tpu.dynamic_rotate %119 by %c4_i32_48 dim 1 : vector<8x8xf32>, i32 -> vector<8x8xf32>
    %c4_i32_49 = arith.constant 4 : i32
    %121 = vector.broadcast %c4_i32_49 : i32 to vector<8x8xi32>
    %122 = arith.cmpi sge, %4, %121 : vector<8x8xi32>
    %cst_50 = arith.constant 0.000000e+00 : f32
    %123 = vector.broadcast %cst_50 : f32 to vector<8x8xf32>
    %124 = arith.select %122, %120, %123 : vector<8x8xi1>, vector<8x8xf32>
    %125 = arith.addf %119, %124 : vector<8x8xf32>
    %cst_51 = arith.constant dense<0.000000e+00> : vector<8xf32>
    %126 = vector.multi_reduction <add>, %107, %cst_51 [1] : vector<8x8xf32> to vector<8xf32>
    %127 = vector.shape_cast %126 : vector<8xf32> to vector<8x1xf32>
    %128 = vector.broadcast %127 : vector<8x1xf32> to vector<8x8xf32>
    %129 = arith.subf %128, %125 : vector<8x8xf32>
    %130 = arith.mulf %129, %12 : vector<8x8xf32>
    %cst_52 = arith.constant 0.000000e+00 : f32
    %131 = vector.broadcast %cst_52 : f32 to vector<8x8xf32>
    %132 = arith.maximumf %130, %131 : vector<8x8xf32>
    %133 = math.sqrt %132 : vector<8x8xf32>
    %c1 = arith.constant 1 : index
    %134 = memref.load %arg2[%c1] : memref<4xf32, #tpu.memory_space<smem>>
    %135 = vector.broadcast %134 : f32 to vector<8x8xf32>
    %136 = arith.mulf %133, %135 : vector<8x8xf32>
    %137 = math.exp %136 : vector<8x8xf32>
    %cst_53 = arith.constant 9.99999974E-6 : f32
    %cst_54 = arith.constant 1.000000e+05 : f32
    %138 = vector.broadcast %cst_53 : f32 to vector<8x8xf32>
    %139 = arith.maximumf %138, %137 : vector<8x8xf32>
    %140 = vector.broadcast %cst_54 : f32 to vector<8x8xf32>
    %141 = arith.minimumf %140, %139 : vector<8x8xf32>
    %142 = arith.mulf %95, %141 : vector<8x8xf32>
    %cst_55 = arith.constant dense<0xFF800000> : vector<8xf32>
    %143 = vector.multi_reduction <maximumf>, %142, %cst_55 [1] : vector<8x8xf32> to vector<8xf32>
    %144 = vector.shape_cast %143 : vector<8xf32> to vector<8x1xf32>
    %145 = vector.broadcast %144 : vector<8x1xf32> to vector<8x8xf32>
    %146 = arith.subf %142, %145 : vector<8x8xf32>
    %147 = math.exp %146 : vector<8x8xf32>
    %cst_56 = arith.constant dense<0.000000e+00> : vector<8xf32>
    %148 = vector.multi_reduction <add>, %147, %cst_56 [1] : vector<8x8xf32> to vector<8xf32>
    %149 = vector.shape_cast %148 : vector<8xf32> to vector<8x1xf32>
    %150 = tpu.reciprocal %149 {approx = true} : vector<8x1xf32> -> vector<8x1xf32>
    %151 = vector.broadcast %150 : vector<8x1xf32> to vector<8x8xf32>
    %152 = arith.mulf %147, %151 : vector<8x8xf32>
    %153 = arith.mulf %152, %16 : vector<8x8xf32>
    %154 = arith.truncf %153 : vector<8x8xf32> to vector<8x8xbf16>
    %cst_57 = arith.constant dense<0.000000e+00> : vector<8x8xf32>
    %155 = tpu.matmul %154, %92, %cst_57 {dimension_numbers = #tpu.dot_dimension_numbers<[1], [0], [0], [1], [0, 0, 1, 1], [], []>} : vector<8x8xbf16>, vector<8x8xbf16>, vector<8x8xf32> -> vector<8x8xf32>
    %c0_58 = arith.constant 0 : index
    %c8_59 = arith.constant 8 : index
    %156 = vector.load %arg7[%c0_58, %c8_59] : memref<8x32xf32, #tpu.memory_space<vmem>>, vector<8x8xf32>
    tpu.vector_store %arg7[%c0_58, %c8_59], %155 {strides = array<i32>} : memref<8x32xf32, #tpu.memory_space<vmem>>, vector<8x8xf32>,
    %c0_60 = arith.constant 0 : index
    %c0_61 = arith.constant 0 : index
    %c16 = arith.constant 16 : index
    %157 = vector.load %arg3[%c0_60, %c0_61, %c16] : memref<1x8x32xbf16, #tpu.memory_space<vmem>>, vector<1x8x8xbf16>
    %158 = vector.shape_cast %157 : vector<1x8x8xbf16> to vector<8x8xbf16>
    %c0_62 = arith.constant 0 : index
    %c0_63 = arith.constant 0 : index
    %c16_64 = arith.constant 16 : index
    %159 = vector.load %arg4[%c0_62, %c0_63, %c16_64] : memref<1x8x32xbf16, #tpu.memory_space<vmem>>, vector<1x8x8xbf16>
    %160 = vector.shape_cast %159 : vector<1x8x8xbf16> to vector<8x8xbf16>
    %c0_65 = arith.constant 0 : index
    %c0_66 = arith.constant 0 : index
    %c16_67 = arith.constant 16 : index
    %161 = vector.load %arg5[%c0_65, %c0_66, %c16_67] : memref<1x8x32xbf16, #tpu.memory_space<vmem>>, vector<1x8x8xbf16>
    %162 = vector.shape_cast %161 : vector<1x8x8xbf16> to vector<8x8xbf16>
    %cst_68 = arith.constant dense<0.000000e+00> : vector<8x8xf32>
    %163 = tpu.matmul %158, %160, %cst_68 {dimension_numbers = #tpu.dot_dimension_numbers<[1], [1], [0], [0], [0, 0, 1, 0], [], []>} : vector<8x8xbf16>, vector<8x8xbf16>, vector<8x8xf32> -> vector<8x8xf32>
    %cst_69 = arith.constant 0.353553385 : f32
    %164 = vector.broadcast %cst_69 : f32 to vector<8x8xf32>
    %165 = arith.mulf %163, %164 : vector<8x8xf32>
    %cst_70 = arith.constant -1.000000e+32 : f32
    %166 = vector.broadcast %cst_70 : f32 to vector<8x8xf32>
    %167 = arith.select %7, %165, %166 : vector<8x8xi1>, vector<8x8xf32>
    %cst_71 = arith.constant dense<0xFF800000> : vector<8xf32>
    %168 = vector.multi_reduction <maximumf>, %167, %cst_71 [1] : vector<8x8xf32> to vector<8xf32>
    %169 = vector.shape_cast %168 : vector<8xf32> to vector<8x1xf32>
    %170 = vector.broadcast %169 : vector<8x1xf32> to vector<8x8xf32>
    %171 = arith.subf %167, %170 : vector<8x8xf32>
    %172 = math.exp %171 : vector<8x8xf32>
    %cst_72 = arith.constant dense<0.000000e+00> : vector<8xf32>
    %173 = vector.multi_reduction <add>, %172, %cst_72 [1] : vector<8x8xf32> to vector<8xf32>
    %174 = vector.shape_cast %173 : vector<8xf32> to vector<8x1xf32>
    %175 = vector.broadcast %174 : vector<8x1xf32> to vector<8x8xf32>
    %176 = arith.divf %172, %175 : vector<8x8xf32>
    %177 = arith.mulf %176, %9 : vector<8x8xf32>
    %c1_i32_73 = arith.constant 1 : i32
    %178 = tpu.dynamic_rotate %177 by %c1_i32_73 dim 1 : vector<8x8xf32>, i32 -> vector<8x8xf32>
    %c1_i32_74 = arith.constant 1 : i32
    %179 = vector.broadcast %c1_i32_74 : i32 to vector<8x8xi32>
    %180 = arith.cmpi sge, %4, %179 : vector<8x8xi32>
    %cst_75 = arith.constant 0.000000e+00 : f32
    %181 = vector.broadcast %cst_75 : f32 to vector<8x8xf32>
    %182 = arith.select %180, %178, %181 : vector<8x8xi1>, vector<8x8xf32>
    %183 = arith.addf %177, %182 : vector<8x8xf32>
    %c2_i32_76 = arith.constant 2 : i32
    %184 = tpu.dynamic_rotate %183 by %c2_i32_76 dim 1 : vector<8x8xf32>, i32 -> vector<8x8xf32>
    %c2_i32_77 = arith.constant 2 : i32
    %185 = vector.broadcast %c2_i32_77 : i32 to vector<8x8xi32>
    %186 = arith.cmpi sge, %4, %185 : vector<8x8xi32>
    %cst_78 = arith.constant 0.000000e+00 : f32
    %187 = vector.broadcast %cst_78 : f32 to vector<8x8xf32>
    %188 = arith.select %186, %184, %187 : vector<8x8xi1>, vector<8x8xf32>
    %189 = arith.addf %183, %188 : vector<8x8xf32>
    %c4_i32_79 = arith.constant 4 : i32
    %190 = tpu.dynamic_rotate %189 by %c4_i32_79 dim 1 : vector<8x8xf32>, i32 -> vector<8x8xf32>
    %c4_i32_80 = arith.constant 4 : i32
    %191 = vector.broadcast %c4_i32_80 : i32 to vector<8x8xi32>
    %192 = arith.cmpi sge, %4, %191 : vector<8x8xi32>
    %cst_81 = arith.constant 0.000000e+00 : f32
    %193 = vector.broadcast %cst_81 : f32 to vector<8x8xf32>
    %194 = arith.select %192, %190, %193 : vector<8x8xi1>, vector<8x8xf32>
    %195 = arith.addf %189, %194 : vector<8x8xf32>
    %cst_82 = arith.constant dense<0.000000e+00> : vector<8xf32>
    %196 = vector.multi_reduction <add>, %177, %cst_82 [1] : vector<8x8xf32> to vector<8xf32>
    %197 = vector.shape_cast %196 : vector<8xf32> to vector<8x1xf32>
    %198 = vector.broadcast %197 : vector<8x1xf32> to vector<8x8xf32>
    %199 = arith.subf %198, %195 : vector<8x8xf32>
    %200 = arith.mulf %199, %12 : vector<8x8xf32>
    %cst_83 = arith.constant 0.000000e+00 : f32
    %201 = vector.broadcast %cst_83 : f32 to vector<8x8xf32>
    %202 = arith.maximumf %200, %201 : vector<8x8xf32>
    %203 = math.sqrt %202 : vector<8x8xf32>
    %c2 = arith.constant 2 : index
    %204 = memref.load %arg2[%c2] : memref<4xf32, #tpu.memory_space<smem>>
    %205 = vector.broadcast %204 : f32 to vector<8x8xf32>
    %206 = arith.mulf %203, %205 : vector<8x8xf32>
    %207 = math.exp %206 : vector<8x8xf32>
    %cst_84 = arith.constant 9.99999974E-6 : f32
    %cst_85 = arith.constant 1.000000e+05 : f32
    %208 = vector.broadcast %cst_84 : f32 to vector<8x8xf32>
    %209 = arith.maximumf %208, %207 : vector<8x8xf32>
    %210 = vector.broadcast %cst_85 : f32 to vector<8x8xf32>
    %211 = arith.minimumf %210, %209 : vector<8x8xf32>
    %212 = arith.mulf %165, %211 : vector<8x8xf32>
    %cst_86 = arith.constant dense<0xFF800000> : vector<8xf32>
    %213 = vector.multi_reduction <maximumf>, %212, %cst_86 [1] : vector<8x8xf32> to vector<8xf32>
    %214 = vector.shape_cast %213 : vector<8xf32> to vector<8x1xf32>
    %215 = vector.broadcast %214 : vector<8x1xf32> to vector<8x8xf32>
    %216 = arith.subf %212, %215 : vector<8x8xf32>
    %217 = math.exp %216 : vector<8x8xf32>
    %cst_87 = arith.constant dense<0.000000e+00> : vector<8xf32>
    %218 = vector.multi_reduction <add>, %217, %cst_87 [1] : vector<8x8xf32> to vector<8xf32>
    %219 = vector.shape_cast %218 : vector<8xf32> to vector<8x1xf32>
    %220 = tpu.reciprocal %219 {approx = true} : vector<8x1xf32> -> vector<8x1xf32>
    %221 = vector.broadcast %220 : vector<8x1xf32> to vector<8x8xf32>
    %222 = arith.mulf %217, %221 : vector<8x8xf32>
    %223 = arith.mulf %222, %16 : vector<8x8xf32>
    %224 = arith.truncf %223 : vector<8x8xf32> to vector<8x8xbf16>
    %cst_88 = arith.constant dense<0.000000e+00> : vector<8x8xf32>
    %225 = tpu.matmul %224, %162, %cst_88 {dimension_numbers = #tpu.dot_dimension_numbers<[1], [0], [0], [1], [0, 0, 1, 1], [], []>} : vector<8x8xbf16>, vector<8x8xbf16>, vector<8x8xf32> -> vector<8x8xf32>
    %c0_89 = arith.constant 0 : index
    %c16_90 = arith.constant 16 : index
    %226 = vector.load %arg7[%c0_89, %c16_90] : memref<8x32xf32, #tpu.memory_space<vmem>>, vector<8x8xf32>
    tpu.vector_store %arg7[%c0_89, %c16_90], %225 {strides = array<i32>} : memref<8x32xf32, #tpu.memory_space<vmem>>, vector<8x8xf32>,
    %c0_91 = arith.constant 0 : index
    %c0_92 = arith.constant 0 : index
    %c24 = arith.constant 24 : index
    %227 = vector.load %arg3[%c0_91, %c0_92, %c24] : memref<1x8x32xbf16, #tpu.memory_space<vmem>>, vector<1x8x8xbf16>
    %228 = vector.shape_cast %227 : vector<1x8x8xbf16> to vector<8x8xbf16>
    %c0_93 = arith.constant 0 : index
    %c0_94 = arith.constant 0 : index
    %c24_95 = arith.constant 24 : index
    %229 = vector.load %arg4[%c0_93, %c0_94, %c24_95] : memref<1x8x32xbf16, #tpu.memory_space<vmem>>, vector<1x8x8xbf16>
    %230 = vector.shape_cast %229 : vector<1x8x8xbf16> to vector<8x8xbf16>
    %c0_96 = arith.constant 0 : index
    %c0_97 = arith.constant 0 : index
    %c24_98 = arith.constant 24 : index
    %231 = vector.load %arg5[%c0_96, %c0_97, %c24_98] : memref<1x8x32xbf16, #tpu.memory_space<vmem>>, vector<1x8x8xbf16>
    %232 = vector.shape_cast %231 : vector<1x8x8xbf16> to vector<8x8xbf16>
    %cst_99 = arith.constant dense<0.000000e+00> : vector<8x8xf32>
    %233 = tpu.matmul %228, %230, %cst_99 {dimension_numbers = #tpu.dot_dimension_numbers<[1], [1], [0], [0], [0, 0, 1, 0], [], []>} : vector<8x8xbf16>, vector<8x8xbf16>, vector<8x8xf32> -> vector<8x8xf32>
    %cst_100 = arith.constant 0.353553385 : f32
    %234 = vector.broadcast %cst_100 : f32 to vector<8x8xf32>
    %235 = arith.mulf %233, %234 : vector<8x8xf32>
    %cst_101 = arith.constant -1.000000e+32 : f32
    %236 = vector.broadcast %cst_101 : f32 to vector<8x8xf32>
    %237 = arith.select %7, %235, %236 : vector<8x8xi1>, vector<8x8xf32>
    %cst_102 = arith.constant dense<0xFF800000> : vector<8xf32>
    %238 = vector.multi_reduction <maximumf>, %237, %cst_102 [1] : vector<8x8xf32> to vector<8xf32>
    %239 = vector.shape_cast %238 : vector<8xf32> to vector<8x1xf32>
    %240 = vector.broadcast %239 : vector<8x1xf32> to vector<8x8xf32>
    %241 = arith.subf %237, %240 : vector<8x8xf32>
    %242 = math.exp %241 : vector<8x8xf32>
    %cst_103 = arith.constant dense<0.000000e+00> : vector<8xf32>
    %243 = vector.multi_reduction <add>, %242, %cst_103 [1] : vector<8x8xf32> to vector<8xf32>
    %244 = vector.shape_cast %243 : vector<8xf32> to vector<8x1xf32>
    %245 = vector.broadcast %244 : vector<8x1xf32> to vector<8x8xf32>
    %246 = arith.divf %242, %245 : vector<8x8xf32>
    %247 = arith.mulf %246, %9 : vector<8x8xf32>
    %c1_i32_104 = arith.constant 1 : i32
    %248 = tpu.dynamic_rotate %247 by %c1_i32_104 dim 1 : vector<8x8xf32>, i32 -> vector<8x8xf32>
    %c1_i32_105 = arith.constant 1 : i32
    %249 = vector.broadcast %c1_i32_105 : i32 to vector<8x8xi32>
    %250 = arith.cmpi sge, %4, %249 : vector<8x8xi32>
    %cst_106 = arith.constant 0.000000e+00 : f32
    %251 = vector.broadcast %cst_106 : f32 to vector<8x8xf32>
    %252 = arith.select %250, %248, %251 : vector<8x8xi1>, vector<8x8xf32>
    %253 = arith.addf %247, %252 : vector<8x8xf32>
    %c2_i32_107 = arith.constant 2 : i32
    %254 = tpu.dynamic_rotate %253 by %c2_i32_107 dim 1 : vector<8x8xf32>, i32 -> vector<8x8xf32>
    %c2_i32_108 = arith.constant 2 : i32
    %255 = vector.broadcast %c2_i32_108 : i32 to vector<8x8xi32>
    %256 = arith.cmpi sge, %4, %255 : vector<8x8xi32>
    %cst_109 = arith.constant 0.000000e+00 : f32
    %257 = vector.broadcast %cst_109 : f32 to vector<8x8xf32>
    %258 = arith.select %256, %254, %257 : vector<8x8xi1>, vector<8x8xf32>
    %259 = arith.addf %253, %258 : vector<8x8xf32>
    %c4_i32_110 = arith.constant 4 : i32
    %260 = tpu.dynamic_rotate %259 by %c4_i32_110 dim 1 : vector<8x8xf32>, i32 -> vector<8x8xf32>
    %c4_i32_111 = arith.constant 4 : i32
    %261 = vector.broadcast %c4_i32_111 : i32 to vector<8x8xi32>
    %262 = arith.cmpi sge, %4, %261 : vector<8x8xi32>
    %cst_112 = arith.constant 0.000000e+00 : f32
    %263 = vector.broadcast %cst_112 : f32 to vector<8x8xf32>
    %264 = arith.select %262, %260, %263 : vector<8x8xi1>, vector<8x8xf32>
    %265 = arith.addf %259, %264 : vector<8x8xf32>
    %cst_113 = arith.constant dense<0.000000e+00> : vector<8xf32>
    %266 = vector.multi_reduction <add>, %247, %cst_113 [1] : vector<8x8xf32> to vector<8xf32>
    %267 = vector.shape_cast %266 : vector<8xf32> to vector<8x1xf32>
    %268 = vector.broadcast %267 : vector<8x1xf32> to vector<8x8xf32>
    %269 = arith.subf %268, %265 : vector<8x8xf32>
    %270 = arith.mulf %269, %12 : vector<8x8xf32>
    %cst_114 = arith.constant 0.000000e+00 : f32
    %271 = vector.broadcast %cst_114 : f32 to vector<8x8xf32>
    %272 = arith.maximumf %270, %271 : vector<8x8xf32>
    %273 = math.sqrt %272 : vector<8x8xf32>
    %c3 = arith.constant 3 : index
    %274 = memref.load %arg2[%c3] : memref<4xf32, #tpu.memory_space<smem>>
    %275 = vector.broadcast %274 : f32 to vector<8x8xf32>
    %276 = arith.mulf %273, %275 : vector<8x8xf32>
    %277 = math.exp %276 : vector<8x8xf32>
    %cst_115 = arith.constant 9.99999974E-6 : f32
    %cst_116 = arith.constant 1.000000e+05 : f32
    %278 = vector.broadcast %cst_115 : f32 to vector<8x8xf32>
    %279 = arith.maximumf %278, %277 : vector<8x8xf32>
    %280 = vector.broadcast %cst_116 : f32 to vector<8x8xf32>
    %281 = arith.minimumf %280, %279 : vector<8x8xf32>
    %282 = arith.mulf %235, %281 : vector<8x8xf32>
    %cst_117 = arith.constant dense<0xFF800000> : vector<8xf32>
    %283 = vector.multi_reduction <maximumf>, %282, %cst_117 [1] : vector<8x8xf32> to vector<8xf32>
    %284 = vector.shape_cast %283 : vector<8xf32> to vector<8x1xf32>
    %285 = vector.broadcast %284 : vector<8x1xf32> to vector<8x8xf32>
    %286 = arith.subf %282, %285 : vector<8x8xf32>
    %287 = math.exp %286 : vector<8x8xf32>
    %cst_118 = arith.constant dense<0.000000e+00> : vector<8xf32>
    %288 = vector.multi_reduction <add>, %287, %cst_118 [1] : vector<8x8xf32> to vector<8xf32>
    %289 = vector.shape_cast %288 : vector<8xf32> to vector<8x1xf32>
    %290 = tpu.reciprocal %289 {approx = true} : vector<8x1xf32> -> vector<8x1xf32>
    %291 = vector.broadcast %290 : vector<8x1xf32> to vector<8x8xf32>
    %292 = arith.mulf %287, %291 : vector<8x8xf32>
    %293 = arith.mulf %292, %16 : vector<8x8xf32>
    %294 = arith.truncf %293 : vector<8x8xf32> to vector<8x8xbf16>
    %cst_119 = arith.constant dense<0.000000e+00> : vector<8x8xf32>
    %295 = tpu.matmul %294, %232, %cst_119 {dimension_numbers = #tpu.dot_dimension_numbers<[1], [0], [0], [1], [0, 0, 1, 1], [], []>} : vector<8x8xbf16>, vector<8x8xbf16>, vector<8x8xf32> -> vector<8x8xf32>
    %c0_120 = arith.constant 0 : index
    %c24_121 = arith.constant 24 : index
    %296 = vector.load %arg7[%c0_120, %c24_121] : memref<8x32xf32, #tpu.memory_space<vmem>>, vector<8x8xf32>
    tpu.vector_store %arg7[%c0_120, %c24_121], %295 {strides = array<i32>} : memref<8x32xf32, #tpu.memory_space<vmem>>, vector<8x8xf32>,
    %c0_122 = arith.constant 0 : index
    %c0_123 = arith.constant 0 : index
    %297 = vector.load %arg7[%c0_122, %c0_123] : memref<8x32xf32, #tpu.memory_space<vmem>>, vector<8x32xf32>
    %298 = arith.truncf %297 : vector<8x32xf32> to vector<8x32xbf16>
    %c0_124 = arith.constant 0 : index
    %c0_125 = arith.constant 0 : index
    %c0_126 = arith.constant 0 : index
    %299 = vector.load %arg6[%c0_124, %c0_125, %c0_126] : memref<1x8x32xbf16, #tpu.memory_space<vmem>>, vector<1x8x32xbf16>
    %300 = vector.shape_cast %299 : vector<1x8x32xbf16> to vector<8x32xbf16>
    %301 = vector.shape_cast %298 : vector<8x32xbf16> to vector<1x8x32xbf16>
    tpu.vector_store %arg6[%c0_124, %c0_125, %c0_126], %301 {strides = array<i32>} : memref<1x8x32xbf16, #tpu.memory_space<vmem>>, vector<1x8x32xbf16>,
    return
  }
  func.func @transform_0(%arg0: i32, %arg1: i32) -> i32 {
    %c0_i32 = arith.constant 0 : i32
    %c0_i32_0 = arith.constant 0 : i32
    return %c0_i32 : i32
  }
  func.func @transform_1(%arg0: i32, %arg1: i32) -> (i32, i32, i32) {
    %c0_i32 = arith.constant 0 : i32
    %c0_i32_0 = arith.constant 0 : i32
    return %arg0, %arg1, %c0_i32 : i32, i32, i32
  }
  func.func @transform_2(%arg0: i32, %arg1: i32) -> (i32, i32, i32) {
    %c0_i32 = arith.constant 0 : i32
    %c0_i32_0 = arith.constant 0 : i32
    %c0_i32_1 = arith.constant 0 : i32
    return %arg0, %c0_i32, %c0_i32_0 : i32, i32, i32
  }
  func.func @transform_3(%arg0: i32, %arg1: i32) -> (i32, i32, i32) {
    %c0_i32 = arith.constant 0 : i32
    %c0_i32_0 = arith.constant 0 : i32
    %c0_i32_1 = arith.constant 0 : i32
    return %arg0, %c0_i32, %c0_i32_0 : i32, i32, i32
  }
  func.func @transform_4(%arg0: i32, %arg1: i32) -> (i32, i32, i32) {
    %c0_i32 = arith.constant 0 : i32
    %c0_i32_0 = arith.constant 0 : i32
    return %arg0, %arg1, %c0_i32 : i32, i32, i32
  }
}

</mosaic_0001>

<bundles_post_ra>
// kernel: tpu_custom_call.1
= control target key start
LH: loop header
LB: loop body
LE: loop exit
PB: predicated region body
PF: predicated region fallthrough
CT: control target
= control target key end

     0   :  { %9 = vsyncpa [#allocation6], 0  ;;  %s1915_s0 = inlined_call_operand.hbm [shape: f32[4], index: 0, kind: input, shape index: {}]   ;;  %s1916_s1 = inlined_call_operand.hbm [shape: bf16[2,8,32], index: 1, kind: input, shape index: {}]   ;;  %s1917_s2 = inlined_call_operand.hbm [shape: bf16[2,8,32], index: 2, kind: input, shape index: {}]   ;;  %s1918_s3 = inlined_call_operand.hbm [shape: bf16[2,8,32], index: 3, kind: input, shape index: {}]   ;;  %s1919_s4 = inlined_call_operand.hbm [shape: bf16[2,8,32], index: 4, kind: output, shape index: {}]  }
   0x1   :  { %10 = vsyncpa [#allocation4], 0 }
   0x2   :  { %12 = vsyncpa [#allocation4 + $0x1], 0 }
   0x3   :  { %13 = vsyncpa [#allocation9], 0 }
   0x4   :  { %14 = vsyncpa [#allocation5], 0 }
   0x5   :  { %16 = vsyncpa [#allocation5 + $0x1], 0  ;;  %s1494_s15 = smov 0   ;;  %s1496_s16 = smov 0  }
   0x6   :  { %s1498_s17 = smov 0   ;;  %s1500_s18 = smov 0  }
   0x7   :  { %s1502_s19 = smov 0   ;;  %s1504_s20 = smov 0  }
   0x8 LB: > { %s1086_s21 = sadd.s32 4294967295, %s1454_s20   ;;  %s1087_s22 = sadd.s32 4294967294, %s1454_s20   ;;  %s1454_s20 = sphi %s1504_s20, %s22_s20   ;;  %s1450_s19 = sphi %s1502_s19, %s1934_s19   ;;  %s1446_s18 = sphi %s1500_s18, %s1933_s18   ;;  %s1442_s17 = sphi %s1498_s17, %s1932_s17   ;;  %s1438_s16 = sphi %s1496_s16, %s1931_s16   ;;  %s1434_s15 = sphi %s1494_s15, %s1930_s15  }
   0x9   : > { %p77_p0 = scmp.ne.s32.totalorder %s1438_s16, %s1434_s15  ;;  %p1528_p1 = scmp.eq.s32.totalorder %s1086_s21, 0 }
   0xa   : > { %p161_p2 = scmp.eq.s32.totalorder %s1087_s22, 1  ;;  %p1088_p4 = scmp.ge.s32.totalorder %s1454_s20, 1 }
   0xb   : > { %p1534_p3 = por %p1528_p1, %p77_p0  ;;  %p168_p6 = scmp.lt.s32.totalorder %s1454_s20, 3 }
   0xc   : > { %p1539_p5 = por %p161_p2, %p77_p0  ;;  %s1544_s26 = sshll.u32 %s1446_s18, 2 }
   0xd   : > { %p1546_p7 = pnand %p1088_p4, %p168_p6  ;;  %s190_s30 = scalar_lea.hbm %s1917_s2, %s1544_s26 }
   0xe   : > { %s192_s5 = sshll.u32 %s190_s30, 4  ;;  %s1456_s6 = smov [#allocation8]   ;;  %s193_s5 = int_to_ptr.hbm [resolvable:$true] %s192_s5 }
   0xf   : > { %p1128_p8 = pneg %p1546_p7  ;;  %s194_s7 = sshll.u32 %s1456_s6, 4  ;;  %s195_s7 = int_to_ptr.vmem [resolvable:$true] %s194_s7 }
  0x10   : > { %s180_s11 = sshll.u32 %s1915_s0, 4  ;;  %s1259_s13 = sshra.s32 %s193_s5, 4  ;;  %s181_s11 = int_to_ptr.hbm [resolvable:$true] %s180_s11  ;;  %s1260_s13 = int_to_ptr.hbm [resolvable:$true] %s1259_s13 }
  0x11   : > { %p1559_p10 = pnand %p1128_p8, %p1534_p3  ;;  %p1568_p11 = pnand %p1128_p8, %p1528_p1 }
  0x12   : > { %s1261_s14 = scalar_lea.hbm %s1260_s13, 4  ;;  %s1266_s28 = scalar_lea.hbm %s1917_s2, 8 }
  0x13   : > { %p1262_p12 = scmp.ne.s32.totalorder %s1260_s13, %s1261_s14  ;;  %p1263_p13 = pneg %p1559_p10 }
  0x14   : > { %p1267_p4 = scmp.lt.s32.totalorder %s1260_s13, %s1917_s2  ;;  %p1268_p6 = scmp.lt.s32.totalorder %s1266_s28, %s1261_s14 }
  0x15   : > { %p1264_p0 = pnand %p1263_p13, %p1262_p12 }
  0x16   : > { %p1269_p8 = por %p1268_p6, %p1267_p4 }
  0x17   : > { %p1265_p2 = pneg %p1264_p0 }
  0x19   : > { %p1270_p9 = pnand %p1269_p8, %p1265_p2 }
  0x1b   : > { %1273 = shalt.err (!%p1270_p9)
}
  0x1c   : > { %1134 = dma.hbm_to_vmem [thread:$0]  (!%p1559_p10), %s193_s5, 64, %s195_s7, [#allocation9]  }
  0x1d   : > { %s1457_s6 = smov [#allocation3]   ;;  %s204_s18 = scalar_lea.hbm %s1918_s3, %s1544_s26 }
  0x1e   : > { %1131 = dma.hbm_to_smem (!%p1568_p11), %s181_s11, 16, %s1457_s6, [#allocation6]  }
  0x1f   : > { %s206_s22 = sshll.u32 %s204_s18, 4  ;;  %s1458_s29 = smov [#allocation10]   ;;  %s207_s22 = int_to_ptr.hbm [resolvable:$true] %s206_s22 }
  0x20   : > { %s208_s13 = sshll.u32 %s1458_s29, 4  ;;  %s1304_s14 = sshra.s32 %s207_s22, 4  ;;  %s209_s13 = int_to_ptr.vmem [resolvable:$true] %s208_s13  ;;  %s1305_s14 = int_to_ptr.hbm [resolvable:$true] %s1304_s14 }
  0x21   : > { %s1306_s28 = scalar_lea.hbm %s1305_s14, 4  ;;  %s1311_s11 = scalar_lea.hbm %s1918_s3, 8 }
  0x22   : > { %p1307_p9 = scmp.ne.s32.totalorder %s1305_s14, %s1306_s28  ;;  %p1312_p11 = scmp.lt.s32.totalorder %s1305_s14, %s1918_s3 }
  0x23   : > { %p1313_p2 = scmp.lt.s32.totalorder %s1311_s11, %s1306_s28 }
  0x24   : > { %p1309_p12 = pnand %p1307_p9, %p1263_p13 }
  0x25   : > { %p1314_p4 = por %p1313_p2, %p1312_p11 }
  0x26   : > { %p1310_p0 = pneg %p1309_p12 }
  0x28   : > { %p1315_p6 = pnand %p1314_p4, %p1310_p0 }
  0x2a   : > { %1318 = shalt.err (!%p1315_p6)
}
  0x2b   : > { %1137 = dma.hbm_to_vmem [thread:$0]  (!%p1559_p10), %s207_s22, 64, %s209_s13, [#allocation9]  }
  0x2c   : > { %p155_p13 = scmp.eq.s32.totalorder %s1086_s21, 1  ;;  %s34_s6 = sadd.s32 1, %s1450_s19 }
  0x2d   : > { %p36_p8 = scmp.ge.s32.totalorder %s34_s6, 2  ;;  %s64_s9 = sadd.s32 1, %s1442_s17 }
  0x2e   : > { %p71_p9 = scmp.ne.s32.totalorder %s1442_s17, %s1438_s16  ;;  %p72_p12 = scmp.eq.s32.totalorder %s1454_s20, 0 }
  0x2f   : > { %s1936_s6 = smov (%p36_p8, %s34_s6), 0  ;;  %p1147_p11 = scmp.lt.s32.totalorder %s1454_s20, 2 }
  0x30   : > { %p1611_p0 = por %p155_p13, %p71_p9  ;;  %s59_s10 = ssub.s32 %s1450_s19, %s1936_s6 }
  0x31   : > { %s219_s18 = sand.u32 1, %s1442_s17   ;;  %p62_p10 = scmp.eq.s32.totalorder %s59_s10, 0 }
  0x32   : > { %p73_p2 = por %p72_p12, %p71_p9  ;;  %s1093_s22 = sshll.u32 %s219_s18, 2 }
  0x33   : > { %s1094_s21 = sshll.u32 %s1450_s19, 2  ;;  %s223_s7 = scalar_lea.vmem [#allocation7], %s1093_s22 }
  0x34   : > { %s1621_s29 = scalar_select %p62_p10, %s1442_s17, %s64_s9  }
  0x35   : > { %s228_s28 = scalar_lea.hbm %s1916_s1, %s1094_s21  ;;  %s232_s11 = sshll.u32 %s223_s7, 4  ;;  %s233_s11 = int_to_ptr.vmem [resolvable:$true] %s232_s11 }
  0x36   : > { %s230_s5 = sshll.u32 %s228_s28, 4  ;;  %p1139_p4 = pnand %p1147_p11, %p73_p2  ;;  %s231_s5 = int_to_ptr.hbm [resolvable:$true] %s230_s5 }
  0x37   : > { %s220_s12 = scalar_lea.sflag [#allocation4], %s219_s18  ;;  %241 = sbr.rel (%p1546_p7) target bundleno = 3702 (0xe76), region = 36 }
  0x38   : > { %1141 = dma.hbm_to_vmem [thread:$0]  (!%p1139_p4), %s231_s5, 64, %s233_s11, %s220_s12  }
  0x3c   : > { %1417 = dma.done.wait (%p1528_p1), [#allocation6], 16  }
  0x3d   : > { %1419 = vsyncadd (%p1528_p1), [#allocation6], 4294967280  ;;  %s1635_s30 = sand.u32 1, %s1438_s16  }
  0x3e   : > { %s1097_s9 = sshll.u32 %s1635_s30, 2  ;;  %s249_s10 = scalar_lea.sflag [#allocation4], %s1635_s30 }
  0x3f   : > { %s1641_s18 = scalar_lea.vmem [#allocation7], %s1097_s9 }
  0x40   : > { %1421 = dma.done.wait (%p1534_p3), %s249_s10, 64  }
  0x41   : > { %1423 = vsyncadd (%p1534_p3), %s249_s10, 4294967232 }
  0x42   : > { %1425 = dma.done.wait (%p1534_p3), [#allocation9], 128  }
  0x43   : > { %1427 = vsyncadd (%p1534_p3), [#allocation9], 4294967168 }
  0x44   : > { %268 = sfence }
  0x45   : > { %v309_v0 = vld [vmem:[#allocation8] sm:$0xf]  ;;  %vm311_vm0 = vcmask 64512   ;;  %v308_v2 = vld [vmem:[%s1641_s18] sm:$0xf]  ;;  %v290_v3 = vlaneseq  ;;  %v1459_v27 = vmov 0.0  }
  0x46   : > { %v316_v1 = vsel %vm311_vm0, %v309_v0, 0  ;;  %s1460_s23 = smov 8   ;;  %vm358_vm6 = vcmask 1047616   ;;  %s1461_s24 = smov 121   ;;  %v458_v0 = vld [vmem:[%s1641_s18] sm:$0xf] }
  0x47   : > { %325 = vmatpush.bf16.xpose.msra.mxu0 %v316_v1  ;;  %v1654_v4 = vshrl.u32 %v290_v3, 7  ;;  %v1656_v5 = vand.u32 127, %v290_v3  ;;  %s1462_s27 = smov 122   ;;  %s1463_s22 = smov 124   ;;  %v462_v1 = vunpack.c.l.b16 %v458_v0  ;;  %v786_v3 = vld [vmem:[%s1641_s18] sm:$0xf] }
  0x48   : > { %s416_s21 = sld [smem:[#allocation3]]  ;;  %s1464_s13 = smov 120   ;;  %vm440_vm13 = vcmask 1043456  }
  0x49   : > { %vm1660_vm1 = vcmp.le.s32.totalorder %v1656_v5, %v1654_v4  ;;  %vm365_vm7 = vcmp.ge.s32.totalorder %v1656_v5, 1  ;;  %vm378_vm8 = vcmp.ge.s32.totalorder %v1656_v5, 2  ;;  %v300_v51 = vsub.s32 %v1656_v5, %v1654_v4  ;;  %s1465_s14 = smov 104   ;;  %s1466_s28 = smov 112  }
  0x4a   : > { %v1674_v28 = vsel %vm1660_vm1, 1.0, %v1459_v27  ;;  %vm391_vm10 = vcmp.ge.s32.totalorder %v1656_v5, 4  ;;  %vm305_vm14 = vcmp.ne.s32.totalorder %v1654_v4, 0  ;;  %s1107_s5 = sld [smem:[#allocation3 + $0x2]]  ;;  %s1467_s12 = smov 16  }
  0x4b   : > { %v302_v52 = vsub.s32 0, %v300_v51  ;;  %vm301_vm9 = vcmp.lt.s32.totalorder %v300_v51, 0  ;;  %s1104_s7 = sld [smem:[#allocation3 + $0x1]]  ;;  %s1468_s10 = smov 24  }
  0x4c   : > { %s1110_s11 = sld [smem:[#allocation3 + $0x3]] }
  0x4d   : > { %v303_v53 = vsel %vm301_vm9, %v302_v52, %v300_v51  ;;  %v622_v51 = vld [vmem:[%s1641_s18] sm:$0xf] }
  0x4e   : > { %1101 = vmatmul.msk.bf16.vlgmr.msra.gmra.mxu0 %vm311_vm0, %v308_v2  ;;  %v1704_v56 = vcvt.s32.f32 %v303_v53  ;;  %v626_v52 = vunpack.c.l.b16 %v622_v51 }
  0x50   : > { %v627_v53 = vpack.c.b16 %v626_v52, %v626_v52 }
  0xcb   : > { %v327_v6 = vpop.f32.mrf.mxu0 }
  0xcc   : > { %v1664_v8 = vmul.f32 0.35355338, %v327_v6  ;;  %v463_v6 = vpack.c.b16 %v462_v1, %v462_v1 }
  0xce   : > { %v332_v9 = vsel %vm1660_vm1, %v1664_v8, -1e+32 }
  0xcf   : > { %v333_v10 = vsel %vm311_vm0, %v332_v9, -inf }
  0xd0   : > { %334 = vmax.xlane.f32.xlu0 %v333_v10  ;;  %v790_v10 = vunpack.c.l.b16 %v786_v3 }
  0xd3   : > { %v329_v11 = vpop.f32.mrf.mxu0 }
 0x143   : > { %v335_v12 = vpop.xlane.xlu0 %334 }
 0x144   : > { %v336_v13 = vsub.f32 %v332_v9, %v335_v12 }
 0x146   : > { %v337_v14 = vmul.f32 1.442695, %v336_v13  ;;  %v791_v13 = vpack.c.b16 %v790_v10, %v790_v10 }
 0x148   : > { %1211 = vpow2.f32 %v337_v14 }
 0x14e   : > { %v1212_v15 = vpop.eup %1211 }
 0x14f   : > { %v339_v16 = vsel %vm311_vm0, %v1212_v15, 0.0 }
 0x150   : > { %340 = vadd.xlane.f32.xlu0 %v339_v16  ;;  %v417_v16 = vstv %s416_s21 }
 0x1c3   : > { %v341_v17 = vpop.xlane.xlu0 %340 }
 0x1c4   : > { %1213 = vrcp.f32 %v341_v17  ;;  %v353_v21 = vand.u32 2147483648, %v341_v17  ;;  %v351_v23 = vand.u32 2147483647, %v341_v17  ;;  %vm347_vm3 = vweird.f32 %v341_v17 }
 0x1c6   : > { %v354_v25 = vor.u32 1.1754944e-38, %v353_v21  ;;  %vm352_vm5 = vcmp.eq.f32.partialorder %v351_v23, 8.507059e+37 }
 0x1ca   : > { %v1214_v18 = vpop.eup %1213 }
 0x1cb   : > { %v343_v19 = vmul.f32 %v1214_v18, %v341_v17  ;;  %vm348_vm2 = vweird.f32 %v1214_v18 }
 0x1cc   : > { %vm349_vm4 = vmor %vm347_vm3, %vm348_vm2 }
 0x1cd   : > { %v344_v20 = vsub.f32 1.0, %v343_v19 }
 0x1cf   : > { %v345_v22 = vmul.f32 %v1214_v18, %v344_v20 }
 0x1d1   : > { %v346_v24 = vadd.f32 %v1214_v18, %v345_v22 }
 0x1d3   : > { %v350_v26 = vsel %vm349_vm4, %v1214_v18, %v346_v24 }
 0x1d4   : > { %v355_v29 = vsel %vm352_vm5, %v354_v25, %v350_v26  ;;  %v623_v26 = vld [vmem:[#allocation8] sm:$0xf] }
 0x1d5   : > { %v356_v30 = vmul.f32 %v1212_v15, %v355_v29  ;;  %v631_v29 = vunpack.c.l.b16 %v623_v26 }
 0x1d7   : > { %v357_v31 = vmul.f32 %v1674_v28, %v356_v30  ;;  %v632_v30 = vpack.c.b16 %v631_v29, %v631_v29 }
 0x1d9   : > { %359 = vrot.lane.b32.xlu1 %v357_v31, %s1460_s23  ;;  %v398_v48 = vsel %vm311_vm0, %v357_v31, 0.0 }
 0x24b   : > { %v360_v32 = vpop.permute.xlu1 %359 }
 0x24c   : > { %v361_v33 = vsel %vm358_vm6, %v360_v32, %v357_v31 }
 0x24d   : > { %362 = vrot.lane.b32.xlu1 %v361_v33, %s1460_s23 }
 0x2bf   : > { %v363_v34 = vpop.permute.xlu1 %362 }
 0x2c0   : > { %v364_v35 = vsel %vm358_vm6, %v363_v34, %v357_v31  ;;  %v787_v34 = vld [vmem:[#allocation8] sm:$0xf] }
 0x2c1   : > { %367 = vrot.lane.b32.xlu2 %v364_v35, %s1461_s24  ;;  %v795_v35 = vunpack.c.l.b16 %v787_v34 }
 0x31b   : > { %v368_v36 = vpop.permute.xlu2 %367 }
 0x31c   : > { %v370_v37 = vsel %vm365_vm7, %v368_v36, 0.0  ;;  %v796_v36 = vpack.c.b16 %v795_v35, %v795_v35 }
 0x31d   : > { %v371_v38 = vadd.f32 %v370_v37, %v357_v31  ;;  %v459_v31 = vld [vmem:[#allocation8] sm:$0xf] }
 0x31e   : > { %v467_v32 = vunpack.c.l.b16 %v459_v31 }
 0x31f   : > { %372 = vrot.lane.b32.xlu2 %v371_v38, %s1460_s23 }
 0x320   : > { %v468_v33 = vpack.c.b16 %v467_v32, %v467_v32 }
 0x379   : > { %v373_v39 = vpop.permute.xlu2 %372 }
 0x37a   : > { %v374_v40 = vsel %vm358_vm6, %v373_v39, %v371_v38 }
 0x37b   : > { %375 = vrot.lane.b32.xlu0 %v374_v40, %s1460_s23 }
 0x383   : > { %633 = vrot.lane.b32.xlu0 %v632_v30, %s1466_s28 }
 0x3ed   : > { %v376_v41 = vpop.permute.xlu0 %375 }
 0x3ee   : > { %v377_v42 = vsel %vm358_vm6, %v376_v41, %v371_v38 }
 0x3ef   : > { %380 = vrot.lane.b32.xlu1 %v377_v42, %s1462_s27 }
 0x3f5   : > { %v634_v41 = vpop.permute.xlu0 %633 }
 0x3f6   : > { %v639_v42 = vsel %vm311_vm0, %v634_v41, 0 }
 0x461   : > { %v381_v43 = vpop.permute.xlu1 %380 }
 0x462   : > { %v383_v44 = vsel %vm378_vm8, %v381_v43, 0.0 }
 0x463   : > { %v384_v45 = vadd.f32 %v383_v44, %v371_v38  ;;  %v310_v38 = vld [vmem:[#allocation10] sm:$0xf] }
 0x464   : > { %v442_v39 = vsel %vm440_vm13, %v310_v38, 0 }
 0x465   : > { %385 = vrot.lane.b32.xlu2 %v384_v45, %s1460_s23  ;;  %451 = vmatpush.bf16.msra.mxu1 %v442_v39 }
 0x469   : > { %648 = vmatpush.bf16.xpose.msrb.mxu1 %v639_v42 }
 0x4bf   : > { %v386_v46 = vpop.permute.xlu2 %385 }
 0x4c0   : > { %v387_v47 = vsel %vm358_vm6, %v386_v46, %v384_v45 }
 0x4c1   : > { %388 = vrot.lane.b32.xlu1 %v387_v47, %s1460_s23 }
 0x4eb   : > { %399 = vadd.xlane.f32.xlu1 %v398_v48 }
 0x504   : > { %464 = vrot.lane.b32.xlu1 %v463_v6, %s1464_s13 }
 0x50c   : > { %792 = vrot.lane.b32.xlu1 %v791_v13, %s1465_s14 }
 0x533   : > { %v389_v49 = vpop.permute.xlu1 %388 }
 0x534   : > { %v390_v50 = vsel %vm358_vm6, %v389_v49, %v384_v45 }
 0x535   : > { %393 = vrot.lane.b32.xlu2 %v390_v50, %s1463_s22 }
 0x55e   : > { %v400_v58 = vpop.xlane.xlu1 %399 }
 0x576   : > { %v465_v47 = vpop.permute.xlu1 %464 }
 0x57e   : > { %v793_v50 = vpop.permute.xlu1 %792 }
 0x58f   : > { %v394_v54 = vpop.permute.xlu2 %393 }
 0x590   : > { %v396_v55 = vsel %vm391_vm10, %v394_v54, 0.0 }
 0x591   : > { %v397_v57 = vadd.f32 %v396_v55, %v384_v45 }
 0x593   : > { %v401_v59 = vsub.f32 %v400_v58, %v397_v57  ;;  %v1727_v57 = vsel %vm305_vm14, 1.0, %v1459_v27 }
 0x595   : > { %v402_v60 = vmul.f32 %v401_v59, %v1704_v56 }
 0x597   : > { %v403_v61 = vmax.f32 %v402_v60, 0.0 }
 0x599   : > { %1215 = vrsqrt.f32 %v403_v61  ;;  %vm411_vm11 = vcmp.eq.f32.partialorder %v403_v61, inf  ;;  %v414_v15 = vand.u32 2147483648, %v403_v61  ;;  %vm413_vm12 = vcmp.eq.f32.partialorder %v403_v61, 0.0 }
 0x59f   : > { %v1216_v62 = vpop.eup %1215 }
 0x5a0   : > { %v405_v63 = vmul.f32 %v1216_v62, %v403_v61 }
 0x5a2   : > { %v406_v2 = vmul.f32 %v1216_v62, %v405_v63 }
 0x5a4   : > { %v407_v9 = vmul.f32 0.5, %v406_v2 }
 0x5a6   : > { %v408_v11 = vsub.f32 1.5, %v407_v9 }
 0x5a8   : > { %v409_v12 = vmul.f32 %v1216_v62, %v408_v11 }
 0x5aa   : > { %v410_v14 = vmul.f32 %v409_v12, %v403_v61 }
 0x5ac   : > { %v412_v17 = vsel %vm411_vm11, %v403_v61, %v410_v14 }
 0x5ad   : > { %v415_v18 = vsel %vm413_vm12, %v414_v15, %v412_v17 }
 0x5ae   : > { %v418_v19 = vmul.f32 %v417_v16, %v415_v18 }
 0x5b0   : > { %v419_v20 = vmul.f32 1.442695, %v418_v19 }
 0x5b2   : > { %1217 = vpow2.f32 %v419_v20 }
 0x5b8   : > { %v1218_v21 = vpop.eup %1217 }
 0x5b9   : > { %v421_v22 = vmax.f32 %v1218_v21, 1e-05 }
 0x5bb   : > { %v422_v23 = vmin.f32 %v421_v22, 100000.0 }
 0x5bd   : > { %v423_v24 = vmul.f32 %v422_v23, %v1664_v8 }
 0x5bf   : > { %v424_v25 = vsel %vm311_vm0, %v423_v24, -inf }
 0x5c0   : > { %425 = vmax.xlane.f32.xlu2 %v424_v25 }
 0x5d8   : > { %469 = vrot.lane.b32.xlu2 %v468_v33, %s1464_s13 }
 0x5e0   : > { %797 = vrot.lane.b32.xlu2 %v796_v36, %s1465_s14 }
 0x633   : > { %v426_v8 = vpop.xlane.xlu2 %425 }
 0x634   : > { %v427_v37 = vsub.f32 %v423_v24, %v426_v8 }
 0x636   : > { %v428_v40 = vmul.f32 1.442695, %v427_v37 }
 0x638   : > { %1219 = vpow2.f32 %v428_v40 }
 0x63b   : > { %v470_v43 = vpop.permute.xlu2 %469 }
 0x63c   : > { %v475_v44 = vsel %vm311_vm0, %v470_v43, 0 }
 0x63d   : > { %484 = vmatpush.bf16.xpose.msra.mxu2 %v475_v44 }
 0x63e   : > { %v1220_v45 = vpop.eup %1219 }
 0x63f   : > { %v430_v46 = vsel %vm311_vm0, %v1220_v45, 0.0 }
 0x640   : > { %431 = vadd.xlane.f32.xlu0 %v430_v46 }
 0x643   : > { %v798_v48 = vpop.permute.xlu2 %797 }
 0x644   : > { %1103 = vmatmul.msk.bf16.vlgmr.msra.gmra.mxu2 %vm311_vm0, %v465_v47  ;;  %v803_v49 = vsel %vm311_vm0, %v798_v48, 0 }
 0x645   : > { %812 = vmatpush.bf16.xpose.msrb.mxu0 %v803_v49 }
 0x64c   : > { %1109 = vmatmul.msk.bf16.vlgmr.msrb.gmra.mxu0 %vm311_vm0, %v793_v50 }
 0x654   : > { %628 = vrot.lane.b32.xlu0 %v627_v53, %s1466_s28 }
 0x6b3   : > { %v432_v54 = vpop.xlane.xlu0 %431 }
 0x6b4   : > { %1221 = vrcp.f32 %v432_v54 }
 0x6ba   : > { %v1222_v55 = vpop.eup %1221 }
 0x6bb   : > { %v434_v58 = vmul.f32 %v1222_v55, %v1220_v45 }
 0x6bd   : > { %v435_v59 = vmul.f32 %v1727_v57, %v434_v58 }
 0x6bf   : > { %v436_v60 = vpack.c.bf16 %v435_v59, %v435_v59 }
 0x6c1   : > { %1102 = vmatmul.msk.bf16.vlgmr.msra.gmra.mxu1 %vm311_vm0, %v436_v60 }
 0x6c6   : > { %v629_v3 = vpop.permute.xlu0 %628 }
 0x6c7   : > { %v486_v61 = vpop.f32.mrf.mxu2 }
 0x6c8   : > { %v1731_v62 = vmul.f32 0.35355338, %v486_v61 }
 0x6c9   : > { %v814_v63 = vpop.f32.mrf.mxu0 }
 0x6ca   : > { %v1733_v0 = vmul.f32 0.35355338, %v814_v63  ;;  %v491_v4 = vsel %vm1660_vm1, %v1731_v62, -1e+32 }
 0x6cb   : > { %v492_v1 = vsel %vm311_vm0, %v491_v4, -inf }
 0x6cc   : > { %493 = vmax.xlane.f32.xlu2 %v492_v1  ;;  %v819_v27 = vsel %vm1660_vm1, %v1733_v0, -1e+32 }
 0x6cd   : > { %v820_v2 = vsel %vm311_vm0, %v819_v27, -inf }
 0x6ce   : > { %821 = vmax.xlane.f32.xlu1 %v820_v2 }
 0x6cf   : > { %v488_v6 = vpop.f32.mrf.mxu2 }
 0x6d1   : > { %1106 = vmatmul.msk.bf16.vlgmr.msrb.gmra.mxu1 %vm311_vm0, %v629_v3  ;;  %v816_v9 = vpop.f32.mrf.mxu0 }
 0x73e   : > { %v453_v10 = vpop.f32.mrf.mxu1 }
 0x73f   : > { %457 = vst.msk [vmem:[#allocation2] sm:$0xff] %vm311_vm0, %v453_v10  ;;  %v494_v11 = vpop.xlane.xlu2 %493 }
 0x740   : > { %v495_v12 = vsub.f32 %v491_v4, %v494_v11 }
 0x741   : > { %v822_v13 = vpop.xlane.xlu1 %821 }
 0x742   : > { %v496_v14 = vmul.f32 1.442695, %v495_v12  ;;  %v823_v15 = vsub.f32 %v819_v27, %v822_v13 }
 0x744   : > { %1223 = vpow2.f32 %v496_v14  ;;  %v824_v16 = vmul.f32 1.442695, %v823_v15 }
 0x746   : > { %1225 = vpow2.f32 %v824_v16  ;;  %v455_v17 = vpop.f32.mrf.mxu1 }
 0x74a   : > { %v1224_v18 = vpop.eup %1223 }
 0x74b   : > { %v498_v19 = vsel %vm311_vm0, %v1224_v18, 0.0 }
 0x74c   : > { %v1226_v20 = vpop.eup %1225  ;;  %499 = vadd.xlane.f32.xlu2 %v498_v19 }
 0x74d   : > { %v826_v21 = vsel %vm311_vm0, %v1226_v20, 0.0 }
 0x74e   : > { %v650_v22 = vpop.f32.mrf.mxu1  ;;  %827 = vadd.xlane.f32.xlu1 %v826_v21 }
 0x74f   : > { %v1747_v23 = vmul.f32 0.35355338, %v650_v22 }
 0x751   : > { %v655_v24 = vsel %vm1660_vm1, %v1747_v23, -1e+32 }
 0x752   : > { %v656_v25 = vsel %vm311_vm0, %v655_v24, -inf }
 0x753   : > { %657 = vmax.xlane.f32.xlu0 %v656_v25 }
 0x756   : > { %v652_v26 = vpop.f32.mrf.mxu1 }
 0x7bf   : > { %v500_v29 = vpop.xlane.xlu2 %499 }
 0x7c0   : > { %1227 = vrcp.f32 %v500_v29  ;;  %v510_v38 = vand.u32 2147483647, %v500_v29  ;;  %v512_v39 = vand.u32 2147483648, %v500_v29  ;;  %vm506_vm1 = vweird.f32 %v500_v29 }
 0x7c1   : > { %v828_v30 = vpop.xlane.xlu1 %827 }
 0x7c2   : > { %1229 = vrcp.f32 %v828_v30  ;;  %v840_v41 = vand.u32 2147483648, %v828_v30  ;;  %v838_v44 = vand.u32 2147483647, %v828_v30  ;;  %v513_v45 = vor.u32 1.1754944e-38, %v512_v39 }
 0x7c3   : > { %vm511_vm4 = vcmp.eq.f32.partialorder %v510_v38, 8.507059e+37  ;;  %vm834_vm5 = vweird.f32 %v828_v30 }
 0x7c4   : > { %v841_v49 = vor.u32 1.1754944e-38, %v840_v41  ;;  %vm839_vm11 = vcmp.eq.f32.partialorder %v838_v44, 8.507059e+37 }
 0x7c6   : > { %v1228_v31 = vpop.eup %1227  ;;  %v658_v32 = vpop.xlane.xlu0 %657 }
 0x7c7   : > { %v502_v33 = vmul.f32 %v1228_v31, %v500_v29  ;;  %v659_v34 = vsub.f32 %v655_v24, %v658_v32  ;;  %vm507_vm15 = vweird.f32 %v1228_v31 }
 0x7c8   : > { %v1230_v35 = vpop.eup %1229  ;;  %vm508_vm3 = vmor %vm506_vm1, %vm507_vm15 }
 0x7c9   : > { %v503_v36 = vsub.f32 1.0, %v502_v33  ;;  %v830_v8 = vmul.f32 %v1230_v35, %v828_v30  ;;  %v660_v37 = vmul.f32 1.442695, %v659_v34  ;;  %vm835_vm2 = vweird.f32 %v1230_v35 }
 0x7ca   : > { %vm836_vm9 = vmor %vm834_vm5, %vm835_vm2  ;;  %vm952_vm5 = vcmask 257024  }
 0x7cb   : > { %v504_v7 = vmul.f32 %v1228_v31, %v503_v36  ;;  %v831_v40 = vsub.f32 1.0, %v830_v8  ;;  %1231 = vpow2.f32 %v660_v37 }
 0x7cd   : > { %v505_v42 = vadd.f32 %v1228_v31, %v504_v7  ;;  %v832_v43 = vmul.f32 %v1230_v35, %v831_v40 }
 0x7cf   : > { %v509_v46 = vsel %vm508_vm3, %v1228_v31, %v505_v42  ;;  %v833_v47 = vadd.f32 %v1230_v35, %v832_v43 }
 0x7d0   : > { %v514_v48 = vsel %vm511_vm4, %v513_v45, %v509_v46  ;;  %vm620_vm4 = vcmask 130112  }
 0x7d1   : > { %v1232_v50 = vpop.eup %1231  ;;  %v515_v51 = vmul.f32 %v1224_v18, %v514_v48  ;;  %v837_v52 = vsel %vm836_vm9, %v1230_v35, %v833_v47 }
 0x7d2   : > { %v842_v53 = vsel %vm839_vm11, %v841_v49, %v837_v52  ;;  %v662_v54 = vsel %vm311_vm0, %v1232_v50, 0.0 }
 0x7d3   : > { %v843_v55 = vmul.f32 %v1226_v20, %v842_v53  ;;  %663 = vadd.xlane.f32.xlu0 %v662_v54  ;;  %v1755_v58 = vmul.f32 %v1674_v28, %v515_v51 }
 0x7d5   : > { %517 = vrot.lane.b32.xlu2 %v1755_v58, %s1460_s23  ;;  %v1760_v59 = vmul.f32 %v1674_v28, %v843_v55 }
 0x7d7   : > { %845 = vrot.lane.b32.xlu1 %v1760_v59, %s1460_s23 }
 0x82f   : > { %v518_v15 = vpop.permute.xlu2 %517 }
 0x830   : > { %v519_v16 = vsel %vm358_vm6, %v518_v15, %v1755_v58 }
 0x846   : > { %v664_v60 = vpop.xlane.xlu0 %663 }
 0x847   : > { %1233 = vrcp.f32 %v664_v60  ;;  %v676_v2 = vand.u32 2147483648, %v664_v60  ;;  %v674_v6 = vand.u32 2147483647, %v664_v60  ;;  %vm670_vm14 = vweird.f32 %v664_v60 }
 0x849   : > { %v846_v61 = vpop.permute.xlu1 %845  ;;  %v677_v10 = vor.u32 1.1754944e-38, %v676_v2  ;;  %vm675_vm1 = vcmp.eq.f32.partialorder %v674_v6, 8.507059e+37 }
 0x84a   : > { %v847_v63 = vsel %vm358_vm6, %v846_v61, %v1760_v59 }
 0x84b   : > { %848 = vrot.lane.b32.xlu1 %v847_v63, %s1460_s23 }
 0x84d   : > { %v1234_v4 = vpop.eup %1233 }
 0x84e   : > { %v666_v1 = vmul.f32 %v1234_v4, %v664_v60  ;;  %vm671_vm12 = vweird.f32 %v1234_v4 }
 0x84f   : > { %vm672_vm15 = vmor %vm670_vm14, %vm671_vm12 }
 0x850   : > { %v667_v27 = vsub.f32 1.0, %v666_v1 }
 0x852   : > { %v668_v3 = vmul.f32 %v1234_v4, %v667_v27  ;;  %v553_v27 = vsel %vm311_vm0, %v1755_v58, 0.0 }
 0x854   : > { %v669_v9 = vadd.f32 %v1234_v4, %v668_v3 }
 0x856   : > { %v673_v11 = vsel %vm672_vm15, %v1234_v4, %v669_v9 }
 0x857   : > { %v678_v12 = vsel %vm675_vm1, %v677_v10, %v673_v11 }
 0x858   : > { %v679_v13 = vmul.f32 %v1232_v50, %v678_v12 }
 0x85a   : > { %v1768_v14 = vmul.f32 %v1674_v28, %v679_v13 }
 0x85c   : > { %681 = vrot.lane.b32.xlu0 %v1768_v14, %s1460_s23  ;;  %v717_v6 = vsel %vm311_vm0, %v1768_v14, 0.0 }
 0x864   : > { %520 = vrot.lane.b32.xlu0 %v519_v16, %s1460_s23 }
 0x8bd   : > { %v849_v17 = vpop.permute.xlu1 %848 }
 0x8be   : > { %v850_v18 = vsel %vm358_vm6, %v849_v17, %v1760_v59 }
 0x8bf   : > { %852 = vrot.lane.b32.xlu1 %v850_v18, %s1461_s24 }
 0x8ce   : > { %v682_v19 = vpop.permute.xlu0 %681 }
 0x8cf   : > { %v683_v28 = vsel %vm358_vm6, %v682_v19, %v1768_v14 }
 0x8d0   : > { %684 = vrot.lane.b32.xlu2 %v683_v28, %s1460_s23 }
 0x8d6   : > { %v521_v20 = vpop.permute.xlu0 %520 }
 0x8d7   : > { %v522_v21 = vsel %vm358_vm6, %v521_v20, %v1755_v58 }
 0x8d8   : > { %524 = vrot.lane.b32.xlu0 %v522_v21, %s1461_s24 }
 0x92a   : > { %v685_v22 = vpop.permute.xlu2 %684 }
 0x92b   : > { %v686_v24 = vsel %vm358_vm6, %v685_v22, %v1768_v14 }
 0x92c   : > { %688 = vrot.lane.b32.xlu2 %v686_v24, %s1461_s24  ;;  %s966_s24 = scalar_lea.hbm %s1919_s4, %s1544_s26 }
 0x92d   : > { %s970_s21 = sshll.u32 %s966_s24, 4  ;;  %s971_s21 = int_to_ptr.hbm [resolvable:$true] %s970_s21 }
 0x931   : > { %v853_v25 = vpop.permute.xlu1 %852 }
 0x932   : > { %v855_v26 = vsel %vm365_vm7, %v853_v25, 0.0 }
 0x933   : > { %v856_v29 = vadd.f32 %v855_v26, %v1760_v59 }
 0x935   : > { %857 = vrot.lane.b32.xlu1 %v856_v29, %s1460_s23 }
 0x94a   : > { %v525_v30 = vpop.permute.xlu0 %524 }
 0x94b   : > { %v527_v31 = vsel %vm365_vm7, %v525_v30, 0.0 }
 0x94c   : > { %v528_v32 = vadd.f32 %v527_v31, %v1755_v58  ;;  %v881_v58 = vsel %vm311_vm0, %v1760_v59, 0.0 }
 0x94e   : > { %529 = vrot.lane.b32.xlu0 %v528_v32, %s1460_s23 }
 0x986   : > { %v689_v33 = vpop.permute.xlu2 %688 }
 0x987   : > { %v691_v34 = vsel %vm365_vm7, %v689_v33, 0.0 }
 0x988   : > { %v692_v35 = vadd.f32 %v691_v34, %v1768_v14 }
 0x98a   : > { %693 = vrot.lane.b32.xlu2 %v692_v35, %s1460_s23 }
 0x9a7   : > { %v858_v36 = vpop.permute.xlu1 %857 }
 0x9a8   : > { %v859_v8 = vsel %vm358_vm6, %v858_v36, %v856_v29 }
 0x9a9   : > { %860 = vrot.lane.b32.xlu1 %v859_v8, %s1460_s23 }
 0x9c0   : > { %v530_v37 = vpop.permute.xlu0 %529 }
 0x9c1   : > { %v531_v38 = vsel %vm358_vm6, %v530_v37, %v528_v32 }
 0x9c2   : > { %532 = vrot.lane.b32.xlu0 %v531_v38, %s1460_s23 }
 0x9e4   : > { %v694_v39 = vpop.permute.xlu2 %693 }
 0x9e5   : > { %v695_v7 = vsel %vm358_vm6, %v694_v39, %v692_v35 }
 0x9e6   : > { %696 = vrot.lane.b32.xlu2 %v695_v7, %s1460_s23 }
 0xa1b   : > { %v861_v40 = vpop.permute.xlu1 %860 }
 0xa1c   : > { %v862_v41 = vsel %vm358_vm6, %v861_v40, %v856_v29 }
 0xa1d   : > { %864 = vrot.lane.b32.xlu1 %v862_v41, %s1462_s27  ;;  %v736_v41 = vstv %s1107_s5 }
 0xa34   : > { %v533_v42 = vpop.permute.xlu0 %532 }
 0xa35   : > { %v534_v43 = vsel %vm358_vm6, %v533_v42, %v528_v32 }
 0xa36   : > { %536 = vrot.lane.b32.xlu0 %v534_v43, %s1462_s27 }
 0xa40   : > { %v697_v44 = vpop.permute.xlu2 %696 }
 0xa41   : > { %v698_v45 = vsel %vm358_vm6, %v697_v44, %v692_v35 }
 0xa42   : > { %700 = vrot.lane.b32.xlu2 %v698_v45, %s1462_s27  ;;  %s288_s27 = scalar_lea.vmem [#allocation11], %s1097_s9  ;;  %s1384_s9 = scalar_lea.hbm %s1919_s4, 8 }
 0xa8f   : > { %v865_v46 = vpop.permute.xlu1 %864 }
 0xa90   : > { %v867_v47 = vsel %vm378_vm8, %v865_v46, 0.0  ;;  %v572_v46 = vstv %s1104_s7 }
 0xa91   : > { %v1813_v48 = vadd.f32 %v867_v47, %v856_v29 }
 0xa93   : > { %869 = vrot.lane.b32.xlu1 %v1813_v48, %s1460_s23 }
 0xa9c   : > { %v701_v49 = vpop.permute.xlu2 %700 }
 0xa9d   : > { %v703_v50 = vsel %vm378_vm8, %v701_v49, 0.0 }
 0xa9e   : > { %v704_v51 = vadd.f32 %v703_v50, %v692_v35 }
 0xaa0   : > { %705 = vrot.lane.b32.xlu2 %v704_v51, %s1460_s23 }
 0xaa8   : > { %v537_v52 = vpop.permute.xlu0 %536 }
 0xaa9   : > { %v539_v53 = vsel %vm378_vm8, %v537_v52, 0.0 }
 0xaaa   : > { %v540_v54 = vadd.f32 %v539_v53, %v528_v32 }
 0xaac   : > { %541 = vrot.lane.b32.xlu0 %v540_v54, %s1460_s23 }
 0xafa   : > { %v706_v55 = vpop.permute.xlu2 %705 }
 0xafb   : > { %v707_v60 = vsel %vm358_vm6, %v706_v55, %v704_v51 }
 0xafc   : > { %708 = vrot.lane.b32.xlu2 %v707_v60, %s1460_s23 }
 0xb05   : > { %v870_v61 = vpop.permute.xlu1 %869 }
 0xb06   : > { %v871_v63 = vsel %vm358_vm6, %v870_v61, %v1813_v48 }
 0xb07   : > { %872 = vrot.lane.b32.xlu1 %v871_v63, %s1460_s23 }
 0xb1e   : > { %v542_v4 = vpop.permute.xlu0 %541 }
 0xb1f   : > { %v543_v1 = vsel %vm358_vm6, %v542_v4, %v540_v54 }
 0xb20   : > { %544 = vrot.lane.b32.xlu0 %v543_v1, %s1460_s23 }
 0xb25   : > { %554 = vadd.xlane.f32.xlu2 %v553_v27 }
 0xb56   : > { %v709_v2 = vpop.permute.xlu2 %708 }
 0xb57   : > { %v710_v3 = vsel %vm358_vm6, %v709_v2, %v704_v51 }
 0xb58   : > { %712 = vrot.lane.b32.xlu1 %v710_v3, %s1463_s22 }
 0xb79   : > { %v873_v11 = vpop.permute.xlu1 %872 }
 0xb7a   : > { %v874_v12 = vsel %vm358_vm6, %v873_v11, %v1813_v48 }
 0xb82   : > { %718 = vadd.xlane.f32.xlu1 %v717_v6 }
 0xb92   : > { %v545_v9 = vpop.permute.xlu0 %544 }
 0xb93   : > { %v546_v10 = vsel %vm358_vm6, %v545_v9, %v540_v54 }
 0xb94   : > { %548 = vrot.lane.b32.xlu0 %v546_v10, %s1463_s22 }
 0xb98   : > { %v555_v25 = vpop.xlane.xlu2 %554 }
 0xb9c   : > { %876 = vrot.lane.b32.xlu0 %v874_v12, %s1463_s22  ;;  %s968_s22 = sshll.u32 %s288_s27, 4  ;;  %s969_s22 = int_to_ptr.vmem [resolvable:$true] %s968_s22 }
 0xbc6   : > { %882 = vadd.xlane.f32.xlu0 %v881_v58 }
 0xbca   : > { %v713_v13 = vpop.permute.xlu1 %712 }
 0xbcb   : > { %v715_v14 = vsel %vm391_vm10, %v713_v13, 0.0 }
 0xbcc   : > { %v716_v15 = vadd.f32 %v715_v14, %v704_v51 }
 0xbf5   : > { %v719_v16 = vpop.xlane.xlu1 %718 }
 0xbf6   : > { %v720_v17 = vsub.f32 %v719_v16, %v716_v15 }
 0xbf8   : > { %v721_v18 = vmul.f32 %v720_v17, %v1704_v56 }
 0xbfa   : > { %v722_v19 = vmax.f32 %v721_v18, 0.0  ;;  %v900_v18 = vstv %s1110_s11 }
 0xbfc   : > { %1235 = vrsqrt.f32 %v722_v19  ;;  %vm730_vm6 = vcmp.eq.f32.partialorder %v722_v19, inf  ;;  %v733_v39 = vand.u32 2147483648, %v722_v19  ;;  %vm732_vm7 = vcmp.eq.f32.partialorder %v722_v19, 0.0 }
 0xc02   : > { %v1236_v28 = vpop.eup %1235 }
 0xc03   : > { %v724_v20 = vmul.f32 %v1236_v28, %v722_v19 }
 0xc05   : > { %v725_v22 = vmul.f32 %v1236_v28, %v724_v20 }
 0xc06   : > { %v549_v21 = vpop.permute.xlu0 %548 }
 0xc07   : > { %v551_v24 = vsel %vm391_vm10, %v549_v21, 0.0  ;;  %v726_v29 = vmul.f32 0.5, %v725_v22 }
 0xc08   : > { %v552_v59 = vadd.f32 %v551_v24, %v540_v54 }
 0xc09   : > { %v727_v32 = vsub.f32 1.5, %v726_v29 }
 0xc0a   : > { %v556_v26 = vsub.f32 %v555_v25, %v552_v59 }
 0xc0b   : > { %v728_v33 = vmul.f32 %v1236_v28, %v727_v32 }
 0xc0c   : > { %v557_v30 = vmul.f32 %v556_v26, %v1704_v56 }
 0xc0d   : > { %v729_v35 = vmul.f32 %v728_v33, %v722_v19 }
 0xc0e   : > { %v558_v31 = vmax.f32 %v557_v30, 0.0  ;;  %v877_v60 = vpop.permute.xlu0 %876 }
 0xc0f   : > { %v731_v37 = vsel %vm730_vm6, %v722_v19, %v729_v35  ;;  %v879_v1 = vsel %vm391_vm10, %v877_v60, 0.0 }
 0xc10   : > { %1237 = vrsqrt.f32 %v558_v31  ;;  %v734_v40 = vsel %vm732_vm7, %v733_v39, %v731_v37  ;;  %vm566_vm8 = vcmp.eq.f32.partialorder %v558_v31, inf  ;;  %v569_v45 = vand.u32 2147483648, %v558_v31 }
 0xc11   : > { %v737_v43 = vmul.f32 %v736_v41, %v734_v40  ;;  %vm568_vm2 = vcmp.eq.f32.partialorder %v558_v31, 0.0  ;;  %v880_v3 = vadd.f32 %v879_v1, %v1813_v48 }
 0xc13   : > { %v738_v50 = vmul.f32 1.442695, %v737_v43 }
 0xc15   : > { %1239 = vpow2.f32 %v738_v50 }
 0xc16   : > { %v1238_v34 = vpop.eup %1237 }
 0xc17   : > { %v560_v36 = vmul.f32 %v1238_v34, %v558_v31 }
 0xc19   : > { %v561_v8 = vmul.f32 %v1238_v34, %v560_v36 }
 0xc1b   : > { %v562_v38 = vmul.f32 0.5, %v561_v8  ;;  %v1240_v53 = vpop.eup %1239 }
 0xc1c   : > { %v740_v63 = vmax.f32 %v1240_v53, 1e-05 }
 0xc1d   : > { %v563_v7 = vsub.f32 1.5, %v562_v38  ;;  %v624_v38 = vld [vmem:[#allocation10] sm:$0xf] }
 0xc1e   : > { %v741_v2 = vmin.f32 %v740_v63, 100000.0  ;;  %v757_v39 = vunpack.c.l.b16 %v624_v38 }
 0xc1f   : > { %v564_v42 = vmul.f32 %v1238_v34, %v563_v7  ;;  %v460_v34 = vld [vmem:[#allocation10] sm:$0xf] }
 0xc20   : > { %v742_v10 = vmul.f32 %v741_v2, %v1747_v23  ;;  %v593_v36 = vunpack.c.l.b16 %v460_v34  ;;  %v758_v7 = vpack.c.b16 %v757_v39, %v757_v39 }
 0xc21   : > { %v565_v44 = vmul.f32 %v564_v42, %v558_v31 }
 0xc22   : > { %v743_v58 = vsel %vm311_vm0, %v742_v10, -inf  ;;  %v594_v8 = vpack.c.b16 %v593_v36, %v593_v36 }
 0xc23   : > { %v567_v47 = vsel %vm566_vm8, %v558_v31, %v565_v44 }
 0xc24   : > { %v570_v49 = vsel %vm568_vm2, %v569_v45, %v567_v47  ;;  %v788_v45 = vld [vmem:[#allocation10] sm:$0xf] }
 0xc25   : > { %v573_v51 = vmul.f32 %v572_v46, %v570_v49  ;;  %v921_v46 = vunpack.c.l.b16 %v788_v45 }
 0xc27   : > { %v574_v52 = vmul.f32 1.442695, %v573_v51  ;;  %v922_v47 = vpack.c.b16 %v921_v46, %v921_v46 }
 0xc29   : > { %1241 = vpow2.f32 %v574_v52 }
 0xc2f   : > { %v1242_v54 = vpop.eup %1241 }
 0xc30   : > { %v576_v55 = vmax.f32 %v1242_v54, 1e-05 }
 0xc32   : > { %v577_v61 = vmin.f32 %v576_v55, 100000.0 }
 0xc34   : > { %v578_v4 = vmul.f32 %v577_v61, %v1731_v62 }
 0xc36   : > { %v579_v27 = vsel %vm311_vm0, %v578_v4, -inf }
 0xc37   : > { %580 = vmax.xlane.f32.xlu2 %v579_v27 }
 0xc39   : > { %v883_v6 = vpop.xlane.xlu0 %882 }
 0xc3a   : > { %v884_v9 = vsub.f32 %v883_v6, %v880_v3 }
 0xc3c   : > { %v885_v11 = vmul.f32 %v884_v9, %v1704_v56 }
 0xc3e   : > { %v886_v12 = vmax.f32 %v885_v11, 0.0 }
 0xc3f   : > { %744 = vmax.xlane.f32.xlu2 %v743_v58 }
 0xc40   : > { %1243 = vrsqrt.f32 %v886_v12  ;;  %vm894_vm10 = vcmp.eq.f32.partialorder %v886_v12, inf  ;;  %v897_v48 = vand.u32 2147483648, %v886_v12  ;;  %vm896_vm3 = vcmp.eq.f32.partialorder %v886_v12, 0.0 }
 0xc46   : > { %v1244_v62 = vpop.eup %1243 }
 0xc47   : > { %v888_v5 = vmul.f32 %v1244_v62, %v886_v12 }
 0xc49   : > { %v889_v13 = vmul.f32 %v1244_v62, %v888_v5 }
 0xc4b   : > { %v890_v14 = vmul.f32 0.5, %v889_v13 }
 0xc4d   : > { %v891_v15 = vsub.f32 1.5, %v890_v14 }
 0xc4f   : > { %v892_v16 = vmul.f32 %v1244_v62, %v891_v15 }
 0xc51   : > { %v893_v17 = vmul.f32 %v892_v16, %v886_v12 }
 0xc53   : > { %v895_v19 = vsel %vm894_vm10, %v886_v12, %v893_v17 }
 0xc54   : > { %v898_v23 = vsel %vm896_vm3, %v897_v48, %v895_v19 }
 0xc55   : > { %v901_v56 = vmul.f32 %v900_v18, %v898_v23 }
 0xc57   : > { %v902_v28 = vmul.f32 1.442695, %v901_v56  ;;  %595 = vrot.lane.b32.xlu2 %v594_v8, %s1464_s13  ;;  %s955_s13 = scalar_lea.sflag [#allocation5], %s1635_s30 }
 0xc59   : > { %1245 = vpow2.f32 %v902_v28 }
 0xc5f   : > { %v1246_v20 = vpop.eup %1245 }
 0xc60   : > { %v904_v21 = vmax.f32 %v1246_v20, 1e-05 }
 0xc62   : > { %v905_v22 = vmin.f32 %v904_v21, 100000.0 }
 0xc64   : > { %v906_v24 = vmul.f32 %v905_v22, %v1733_v0 }
 0xc66   : > { %v907_v59 = vsel %vm311_vm0, %v906_v24, -inf }
 0xc67   : > { %908 = vmax.xlane.f32.xlu1 %v907_v59 }
 0xcaa   : > { %v581_v25 = vpop.xlane.xlu2 %580 }
 0xcab   : > { %v582_v26 = vsub.f32 %v578_v4, %v581_v25 }
 0xcad   : > { %v583_v29 = vmul.f32 1.442695, %v582_v26 }
 0xcaf   : > { %1247 = vpow2.f32 %v583_v29 }
 0xcb2   : > { %v745_v30 = vpop.xlane.xlu2 %744 }
 0xcb3   : > { %v746_v31 = vsub.f32 %v742_v10, %v745_v30 }
 0xcb5   : > { %v1248_v32 = vpop.eup %1247  ;;  %v747_v33 = vmul.f32 1.442695, %v746_v31 }
 0xcb6   : > { %v585_v35 = vsel %vm311_vm0, %v1248_v32, 0.0 }
 0xcb7   : > { %1249 = vpow2.f32 %v747_v33  ;;  %586 = vadd.xlane.f32.xlu0 %v585_v35 }
 0xcba   : > { %v596_v49 = vpop.permute.xlu2 %595 }
 0xcbb   : > { %v601_v50 = vsel %vm440_vm13, %v596_v49, 0 }
 0xcbc   : > { %610 = vmatpush.bf16.msra.mxu3 %v601_v50 }
 0xcbd   : > { %v1250_v0 = vpop.eup %1249 }
 0xcbe   : > { %v749_v37 = vsel %vm311_vm0, %v1250_v0, 0.0 }
 0xcbf   : > { %750 = vadd.xlane.f32.xlu1 %v749_v37 }
 0xcd8   : > { %759 = vrot.lane.b32.xlu1 %v758_v7, %s1466_s28 }
 0xcda   : > { %v909_v40 = vpop.xlane.xlu1 %908 }
 0xcdb   : > { %v910_v41 = vsub.f32 %v906_v24, %v909_v40 }
 0xcdd   : > { %v911_v42 = vmul.f32 1.442695, %v910_v41 }
 0xcdf   : > { %1251 = vpow2.f32 %v911_v42 }
 0xce5   : > { %v1252_v43 = vpop.eup %1251 }
 0xce6   : > { %v913_v44 = vsel %vm311_vm0, %v1252_v43, 0.0 }
 0xce7   : > { %914 = vadd.xlane.f32.xlu0 %v913_v44 }
 0xcfb   : > { %923 = vrot.lane.b32.xlu0 %v922_v47, %s1465_s14  ;;  %s1378_s14 = sshra.s32 %s971_s21, 4  ;;  %s1379_s14 = int_to_ptr.hbm [resolvable:$true] %s1378_s14 }
 0xcfc   : > { %s1380_s28 = scalar_lea.hbm %s1379_s14, 4  ;;  %p1385_p6 = scmp.lt.s32.totalorder %s1379_s14, %s1919_s4 }
 0xcfd   : > { %p1381_p1 = scmp.ne.s32.totalorder %s1379_s14, %s1380_s28  ;;  %p1386_p13 = scmp.lt.s32.totalorder %s1384_s9, %s1380_s28 }
 0xcff   : > { %p1382_p3 = pnand %p1381_p1, %p1611_p0  ;;  %p1387_p8 = por %p1386_p13, %p1385_p6 }
 0xd01   : > { %p1383_p7 = pneg %p1382_p3 }
 0xd03   : > { %p1388_p9 = pnand %p1387_p8, %p1383_p7 }
 0xd2a   : > { %v587_v51 = vpop.xlane.xlu0 %586 }
 0xd2b   : > { %1253 = vrcp.f32 %v587_v51 }
 0xd31   : > { %v1254_v52 = vpop.eup %1253 }
 0xd32   : > { %v589_v53 = vmul.f32 %v1254_v52, %v1248_v32  ;;  %v751_v60 = vpop.xlane.xlu1 %750 }
 0xd33   : > { %1255 = vrcp.f32 %v751_v60 }
 0xd34   : > { %v590_v54 = vmul.f32 %v1727_v57, %v589_v53 }
 0xd36   : > { %v591_v55 = vpack.c.bf16 %v590_v54, %v590_v54 }
 0xd38   : > { %1105 = vmatmul.msk.bf16.vlgmr.msra.gmra.mxu3 %vm311_vm0, %v591_v55 }
 0xd39   : > { %v1256_v61 = vpop.eup %1255 }
 0xd3a   : > { %v753_v63 = vmul.f32 %v1256_v61, %v1250_v0 }
 0xd3c   : > { %v754_v4 = vmul.f32 %v1727_v57, %v753_v63 }
 0xd3e   : > { %v755_v2 = vpack.c.bf16 %v754_v4, %v754_v4 }
 0xd4a   : > { %v760_v1 = vpop.permute.xlu1 %759 }
 0xd4b   : > { %v765_v27 = vsel %vm440_vm13, %v760_v1, 0 }
 0xd4c   : > { %774 = vmatpush.bf16.msrb.mxu3 %v765_v27 }
 0xd4f   : > { %1108 = vmatmul.msk.bf16.vlgmr.msrb.gmra.mxu3 %vm311_vm0, %v755_v2 }
 0xd5a   : > { %v915_v3 = vpop.xlane.xlu0 %914 }
 0xd5b   : > { %1257 = vrcp.f32 %v915_v3 }
 0xd61   : > { %v1258_v6 = vpop.eup %1257 }
 0xd62   : > { %v917_v9 = vmul.f32 %v1258_v6, %v1252_v43 }
 0xd64   : > { %v918_v10 = vmul.f32 %v1727_v57, %v917_v9 }
 0xd66   : > { %v919_v58 = vpack.c.bf16 %v918_v10, %v918_v10 }
 0xd6d   : > { %v924_v11 = vpop.permute.xlu0 %923 }
 0xd6e   : > { %v929_v12 = vsel %vm440_vm13, %v924_v11, 0  ;;  %vm784_vm13 = vcmask 195712  }
 0xd6f   : > { %938 = vmatpush.bf16.msrb.mxu2 %v929_v12 }
 0xd72   : > { %1111 = vmatmul.msk.bf16.vlgmr.msrb.gmra.mxu2 %vm311_vm0, %v919_v58  ;;  %vm948_vm0 = vcmask 261312  }
 0xdbb   : > { %v612_v62 = vpop.f32.mrf.mxu3 }
 0xdbc   : > { %617 = vrot.lane.b32.xlu2 %v612_v62, %s1460_s23 }
 0xdc3   : > { %v614_v5 = vpop.f32.mrf.mxu3 }
 0xdd2   : > { %v776_v13 = vpop.f32.mrf.mxu3 }
 0xdd3   : > { %781 = vrot.lane.b32.xlu2 %v776_v13, %s1467_s12 }
 0xdda   : > { %v778_v14 = vpop.f32.mrf.mxu3 }
 0xdf5   : > { %v940_v15 = vpop.f32.mrf.mxu2 }
 0xdf6   : > { %945 = vrot.lane.b32.xlu0 %v940_v15, %s1468_s10 }
 0xdfd   : > { %v942_v57 = vpop.f32.mrf.mxu2 }
 0xe16   : > { %v618_v16 = vpop.permute.xlu2 %617 }
 0xe17   : > { %621 = vst.msk [vmem:[#allocation2] sm:$0xff] %vm620_vm4, %v618_v16 }
 0xe2d   : > { %v782_v17 = vpop.permute.xlu2 %781 }
 0xe2e   : > { %785 = vst.msk [vmem:[#allocation2] sm:$0xff] %vm784_vm13, %v782_v17 }
 0xe68   : > { %v946_v48 = vpop.permute.xlu0 %945 }
 0xe69   : > { %949 = vst.msk [vmem:[#allocation2] sm:$0xff] %vm948_vm0, %v946_v48 }
 0xe70   : > { %v950_v18 = vld [vmem:[#allocation2] sm:$0xff] }
 0xe71   : > { %v951_v19 = vpack.c.bf16 %v950_v18, %v950_v18 }
 0xe73   : > { %953 = vst.msk [vmem:[%s288_s27] sm:$0xf] %vm952_vm5, %v951_v19 }
 0xe74   : > { %1391 = shalt.err (!%p1388_p9)
}
 0xe75   : > { %1126 = dma.vmem_to_hbm [thread:$0]  (%p1611_p0), %s969_s22, 64, %s971_s21, %s955_s13  }
 0xe76 PF: > { %s982_s30 = sand.u32 1, %s1434_s15   ;;  %p1929_p12 = scmp.ge.s32.totalorder %s1454_s20, 2 }
 0xe77   : > { %s983_s12 = scalar_lea.sflag [#allocation5], %s982_s30 }
 0xe78   : > { %p1143_p11 = pnand %p1929_p12, %p1539_p5 }
 0xe7a   : > { %p1144_p10 = pneg %p1143_p11 }
 0xe7c   : > { %1429 = dma.done.wait (%p1144_p10), %s983_s12, 64  }
 0xe7d   : > { %1431 = vsyncadd (%p1144_p10), %s983_s12, 4294967232  ;;  %s22_s20 = sadd.s32 1, %s1454_s20   ;;  %s1930_s15 = smov %s1438_s16 }
 0xe7e   : > { %p19_p2 = scmp.ge.s32.totalorder %s22_s20, 4   ;;  %s1931_s16 = smov %s1442_s17 }
 0xe7f   : > { %s1932_s17 = smov %s1621_s29  ;;  %s1933_s18 = smov %s1450_s19 }
 0xe80   : > { %s1934_s19 = smov %s1936_s6  ;;  %21 = sbr.rel (!%p19_p2) target bundleno = 8 (0x8), region = 96 }
 0xe85   :  { %989 = vsyncpa [#allocation4], 1 }
 0xe86   :  { %991 = vsyncpa [#allocation4 + $0x1], 1 }
 0xe87   :  { %992 = vsyncpa [#allocation9], 1 }
 0xe88   :  { %993 = vsyncpa [#allocation5], 1 }
 0xe89   :  { %995 = vsyncpa [#allocation5 + $0x1], 1 }
 0xe8a   :  { %996 = vsyncpa [#allocation6], 1 }
 0xe8b   :  { %998 = vsyncpa [#allocation6 + $0x1], 1 }

</bundles_post_ra>
